<compile_context>
chip_gen: v6e
topology: v6e:2x2x1
jax: 0.10.0
libtpu: 0.0.40
codegen_flags: <defaults>
</compile_context>

<pallas_src>
import functools

import jax
import jax.numpy as jnp
from jax import lax
from jax.experimental import pallas as pl
from jax.experimental.pallas import tpu as pltpu

_EPS = 1e-5
_TQ_MAX = 2048      # lane tile of the flattened H*W axis inside the conv kernel


# ----------------------------------- Pallas kernels -----------------------------------------

def _conv_tap_kernel(x0_ref, x1_ref, x2_ref, w_ref, m_ref,
                     y_ref, s_ref, ss_ref, a_ref, *, cin, cout, wp, q, tq):
    """One (n, d) output plane of a 3x3x3 stride-1 pad-1 conv.

    x{0,1,2}_ref : (1, 1, cin, Lrow)   padded input planes d, d+1, d+2 (matmul dtype)
    w_ref        : (cout, 27*cin)      taps folded into the contraction dimension
    m_ref        : (1, q) f32          1.0 on valid output columns, 0.0 on padding garbage
    y_ref        : (1, 1, cout, q) f32 pre-BN conv output (garbage columns zeroed)
    s_ref/ss_ref : (1, 1, cout, 1) f32 per-plane channel sum / sum-of-squares (for BN stats)
    a_ref        : (27*cin, tq) VMEM   gathered tap matrix for one lane tile
    """
    x_refs = (x0_ref, x1_ref, x2_ref)
    wm = w_ref[...]
    s_acc = jnp.zeros((cout, 1), jnp.float32)
    ss_acc = jnp.zeros((cout, 1), jnp.float32)
    for q0 in range(0, q, tq):                    # static lane-tile loop (1 iter at test sizes)
        cq = min(tq, q - q0)
        for kd in range(3):                       # gather the 27 taps from the halo'd planes
            xk = x_refs[kd]
            for kh in range(3):
                for kw in range(3):
                    tap = (kd * 3 + kh) * 3 + kw
                    src = q0 + kh * wp + kw
                    a_ref[tap * cin:(tap + 1) * cin, :cq] = xk[0, 0, :, src:src + cq]
        # one K = 27*cin MXU matmul per lane tile, f32 accumulation
        acc = jnp.dot(wm, a_ref[:, :cq], preferred_element_type=jnp.float32)
        acc = acc * m_ref[:, q0:q0 + cq]          # zero garbage columns -> BN sums stay exact
        y_ref[0, 0, :, q0:q0 + cq] = acc
        s_acc = s_acc + jnp.sum(acc, axis=1, keepdims=True)
        ss_acc = ss_acc + jnp.sum(acc * acc, axis=1, keepdims=True)
    s_ref[0, 0, :, :] = s_acc
    ss_ref[0, 0, :, :] = ss_acc


def _bn_relu_kernel(y_ref, scale_ref, shift_ref, o_ref):
    # y_ref/o_ref: (1, 1, C, L) with L on the lane axis; scale/shift: (C, 1) broadcast on lanes.
    o_ref[0, 0, :, :] = jnp.maximum(y_ref[0, 0, :, :] * scale_ref[...] + shift_ref[...], 0.0)


# ------------------------------------- conv wrappers -----------------------------------------

def _conv3d_raw(x5, w, compute_dtype):
    """Stride-1 pad-1 3x3x3 conv on internal layout (N, D, C, H, W).

    Returns:
      y    : (N, D, Cout, H*(W+2)) f32; 2 trailing columns per W-row are zeroed padding garbage
      ssum : (N, D, Cout, 1) f32 channel sums over valid positions
      ssq  : (N, D, Cout, 1) f32 channel sums of squares over valid positions
    """
    N, D, Cin, H, W = x5.shape
    Cout = w.shape[0]
    Wp = W + 2                       # padded row width
    Q = H * Wp                       # flattened per-d output row (incl. 2 garbage cols / row)
    Lrow = (H + 3) * Wp              # padded + flattened input row (1 top, 1 bottom, 1 slack row)
    tq = min(Q, _TQ_MAX)

    # single zero-pad pass (D:1/1, H:1/2, W:1/1), flatten (H+3, W+2), cast for the MXU
    xr = jnp.pad(x5, ((0, 0), (1, 1), (0, 0), (1, 2), (1, 1)))
    xr = xr.reshape(N, D + 2, Cin, Lrow).astype(compute_dtype)
    wmat = jnp.transpose(w, (0, 2, 3, 4, 1)).reshape(Cout, 27 * Cin).astype(compute_dtype)
    mask = (jnp.arange(Q, dtype=jnp.int32) % Wp < W).astype(jnp.float32).reshape(1, Q)

    kernel = functools.partial(_conv_tap_kernel, cin=Cin, cout=Cout, wp=Wp, q=Q, tq=tq)
    y, ssum, ssq = pl.pallas_call(
        kernel,
        grid=(N, D),
        in_specs=[
            pl.BlockSpec((1, 1, Cin, Lrow), lambda n, d: (n, d, 0, 0)),      # plane d-1 (padded)
            pl.BlockSpec((1, 1, Cin, Lrow), lambda n, d: (n, d + 1, 0, 0)),  # plane d
            pl.BlockSpec((1, 1, Cin, Lrow), lambda n, d: (n, d + 2, 0, 0)),  # plane d+1
            pl.BlockSpec((Cout, 27 * Cin), lambda n, d: (0, 0)),             # weights (resident)
            pl.BlockSpec((1, Q), lambda n, d: (0, 0)),                       # valid-column mask
        ],
        out_specs=[
            pl.BlockSpec((1, 1, Cout, Q), lambda n, d: (n, d, 0, 0)),
            pl.BlockSpec((1, 1, Cout, 1), lambda n, d: (n, d, 0, 0)),
            pl.BlockSpec((1, 1, Cout, 1), lambda n, d: (n, d, 0, 0)),
        ],
        out_shape=(
            jax.ShapeDtypeStruct((N, D, Cout, Q), jnp.float32),
            jax.ShapeDtypeStruct((N, D, Cout, 1), jnp.float32),
            jax.ShapeDtypeStruct((N, D, Cout, 1), jnp.float32),
        ),
        scratch_shapes=[pltpu.VMEM((27 * Cin, tq), compute_dtype)],
        compiler_params=pltpu.CompilerParams(
            dimension_semantics=("parallel", "parallel")),
    )(xr, xr, xr, wmat, mask)
    return y, ssum, ssq


def _bn_relu_apply(y4, scale, shift):
    """relu(y*scale + shift) on a (N, D, C, L) tensor; scale/shift are (C, 1) f32."""
    N, D, C, L = y4.shape
    return pl.pallas_call(
        _bn_relu_kernel,
        grid=(N, D),
        in_specs=[
            pl.BlockSpec((1, 1, C, L), lambda n, d: (n, d, 0, 0)),
            pl.BlockSpec((C, 1), lambda n, d: (0, 0)),
            pl.BlockSpec((C, 1), lambda n, d: (0, 0)),
        ],
        out_specs=pl.BlockSpec((1, 1, C, L), lambda n, d: (n, d, 0, 0)),
        out_shape=jax.ShapeDtypeStruct((N, D, C, L), jnp.float32),
        compiler_params=pltpu.CompilerParams(
            dimension_semantics=("parallel", "parallel")),
    )(y4, scale, shift)


def conv_bn_relu_s1(x5, w, gamma, beta, compute_dtype):
    """Conv3d(k=3, s=1, p=1, bias=False) + training-mode BatchNorm3d + ReLU (internal layout)."""
    N, D, _, H, W = x5.shape
    Cout = w.shape[0]
    Wp = W + 2
    y, ssum, ssq = _conv3d_raw(x5, w, compute_dtype)
    count = N * D * H * W
    # NOTE: E[x^2]-mean^2 in f32; fine at these scales (activations are BN-normalised).
    mean = jnp.sum(ssum, axis=(0, 1)) / count                     # (Cout, 1)
    var = jnp.sum(ssq, axis=(0, 1)) / count - mean * mean         # biased, as PyTorch training BN
    scale = gamma.reshape(-1, 1) * lax.rsqrt(var + _EPS)
    shift = beta.reshape(-1, 1) - mean * scale
    o = _bn_relu_apply(y, scale, shift)
    return o.reshape(N, D, Cout, H, Wp)[..., :W]                  # drop the 2 garbage cols / row


def conv_bn_relu_s2(x5, w, gamma, beta, compute_dtype):
    """Conv3d(k=3, s=2, p=1, bias=False) + BN + ReLU."""
    # TODO(synk): a dedicated stride-2 tap gather (lane stride-2 slices) would avoid the 8x
    # extra MXU work of computing the stride-1 result and subsampling it.
    N, D, _, H, W = x5.shape
    Cout = w.shape[0]
    Wp = W + 2
    y, _, _ = _conv3d_raw(x5, w, compute_dtype)
    y5 = y.reshape(N, D, Cout, H, Wp)[:, ::2, :, ::2, :W:2]       # (N, D//2, Cout, H//2, W//2)
    Do, Ho, Wo = D // 2, H // 2, W // 2
    mean = jnp.mean(y5, axis=(0, 1, 3, 4)).reshape(-1, 1)
    var = jnp.var(y5, axis=(0, 1, 3, 4)).reshape(-1, 1)
    scale = gamma.reshape(-1, 1) * lax.rsqrt(var + _EPS)
    shift = beta.reshape(-1, 1) - mean * scale
    o = _bn_relu_apply(y5.reshape(N, Do, Cout, Ho * Wo), scale, shift)
    return o.reshape(N, Do, Cout, Ho, Wo)


def deconv_bn_relu(x5, wt, gamma, beta, compute_dtype):
    """ConvTranspose3d(k=3, s=2, p=1, output_padding=1, bias=False) + BN + ReLU.

    Lowered to zero-dilation (plus one trailing zero per spatial dim) followed by the stride-1
    conv kernel with the flipped, in/out-transposed weight.
    """
    # TODO(synk): a phase-decomposed deconv kernel would avoid multiplying the 7/8 inserted zeros.
    xd = lax.pad(x5, jnp.zeros((), x5.dtype),
                 ((0, 0, 0), (0, 1, 1), (0, 0, 0), (0, 1, 1), (0, 1, 1)))
    w = jnp.transpose(jnp.flip(wt, axis=(2, 3, 4)), (1, 0, 2, 3, 4))   # (Cout, Cin, 3, 3, 3)
    return conv_bn_relu_s1(xd, w, gamma, beta, compute_dtype)


def conv3d_plain(x5, w, compute_dtype):
    """Conv3d(k=3, s=1, p=1, bias=False) with no BN / ReLU (the `prob` head)."""
    N, D, _, H, W = x5.shape
    Cout = w.shape[0]
    Wp = W + 2
    y, _, _ = _conv3d_raw(x5, w, compute_dtype)
    return y.reshape(N, D, Cout, H, Wp)[..., :W]


# --------------------------------- full network forward --------------------------------------

def costregnet_forward(x, params, compute_dtype=jnp.bfloat16):
    """x: (N, C_in, D, H, W) with D, H, W divisible by 4.  Returns (prob, pro) in NCDHW."""
    # TODO(synk): BatchNorm running_mean/running_var momentum updates (training-time side
    # effect) are not materialised; the forward outputs do not depend on them.
    t = jnp.transpose(x, (0, 2, 1, 3, 4)).astype(jnp.float32)     # internal (N, D, C, H, W)

    def cbr(v, name):
        w, g, b = params[name]
        return conv_bn_relu_s1(v, w, g, b, compute_dtype)

    def cbr2(v, name):
        w, g, b = params[name]
        return conv_bn_relu_s2(v, w, g, b, compute_dtype)

    def dbr(v, name):
        w, g, b = params[name]
        return deconv_bn_relu(v, w, g, b, compute_dtype)

    c0 = cbr(t, "conv0")
    c0 = cbr(c0, "conv0_1")
    c0 = cbr(c0, "conv0_2")
    c0 = cbr(c0, "conv0_3")
    c1 = cbr2(c0, "conv1")
    c1 = cbr(c1, "conv1_1")
    c1 = cbr(c1, "conv1_2")
    c1 = cbr(c1, "conv1_3")
    c2 = cbr2(c1, "conv2")
    c2 = cbr(c2, "conv2_1")
    c2 = cbr(c2, "conv2_2")
    c2 = cbr(c2, "conv2_3")
    u3 = c1 + dbr(c2, "conv3")            # skip connection (plain elementwise add)
    pro = c0 + dbr(u3, "conv4")
    prob = conv3d_plain(pro, params["prob"][0], compute_dtype)

    prob = jnp.transpose(prob, (0, 2, 1, 3, 4))   # -> (N, 1, D, H, W)
    pro = jnp.transpose(pro, (0, 2, 1, 3, 4))     # -> (N, base_channels, D, H, W)
    return prob, pro


# -------------------------------------- reference --------------------------------------------

def reference_forward(x, params, compute_dtype=jnp.bfloat16, eps=_EPS):
    """Pure-XLA reference mirroring the PyTorch module, with the same bf16 matmul-input
    casting points as the Pallas path (so the comparison isolates kernel correctness)."""
    dn = ("NCDHW", "OIDHW", "NCDHW")

    def conv(v, w, stride=1):
        return lax.conv_general_dilated(
            v.astype(compute_dtype), w.astype(compute_dtype), (stride,) * 3,
            ((1, 1),) * 3, dimension_numbers=dn, preferred_element_type=jnp.float32)

    def deconv(v, wt):
        w = jnp.transpose(jnp.flip(wt, axis=(2, 3, 4)), (1, 0, 2, 3, 4))
        return lax.conv_general_dilated(
            v.astype(compute_dtype), w.astype(compute_dtype), (1, 1, 1),
            ((1, 2),) * 3, lhs_dilation=(2, 2, 2), dimension_numbers=dn,
            preferred_element_type=jnp.float32)

    def bn_relu(y, g, b):
        m = jnp.mean(y, axis=(0, 2, 3, 4), keepdims=True)
        v = jnp.var(y, axis=(0, 2, 3, 4), keepdims=True)
        return jnp.maximum((y - m) * lax.rsqrt(v + eps) * g.reshape(1, -1, 1, 1, 1)
                           + b.reshape(1, -1, 1, 1, 1), 0.0)

    def cbr(v, name, stride=1):
        w, g, b = params[name]
        return bn_relu(conv(v, w, stride), g, b)

    def dbr(v, name):
        w, g, b = params[name]
        return bn_relu(deconv(v, w), g, b)

    c0 = cbr(x, "conv0")
    c0 = cbr(c0, "conv0_1")
    c0 = cbr(c0, "conv0_2")
    c0 = cbr(c0, "conv0_3")
    c1 = cbr(c0, "conv1", 2)
    c1 = cbr(c1, "conv1_1")
    c1 = cbr(c1, "conv1_2")
    c1 = cbr(c1, "conv1_3")
    c2 = cbr(c1, "conv2", 2)
    c2 = cbr(c2, "conv2_1")
    c2 = cbr(c2, "conv2_2")
    c2 = cbr(c2, "conv2_3")
    u3 = c1 + dbr(c2, "conv3")
    pro = c0 + dbr(u3, "conv4")
    prob = conv(pro, params["prob"][0])
    return prob, pro


# ----------------------------------------- test -----------------------------------------------

if __name__ == "__main__":
    key = jax.random.PRNGKey(0)
    N, C_IN, BC = 2, 4, 8
    D, H, W = 8, 16, 16

    kit = iter(jax.random.split(key, 32))

    def conv_p(cin, cout):
        w = 0.1 * jax.random.normal(next(kit), (cout, cin, 3, 3, 3), jnp.float32)
        return (w, jnp.ones((cout,), jnp.float32), jnp.zeros((cout,), jnp.float32))

    def deconv_p(cin, cout):
        w = 0.1 * jax.random.normal(next(kit), (cin, cout, 3, 3, 3), jnp.float32)
        return (w, jnp.ones((cout,), jnp.float32), jnp.zeros((cout,), jnp.float32))

    params = {
        "conv0": conv_p(C_IN, BC),
        "conv0_1": conv_p(BC, BC), "conv0_2": conv_p(BC, BC), "conv0_3": conv_p(BC, BC),
        "conv1": conv_p(BC, 2 * BC),
        "conv1_1": conv_p(2 * BC, 2 * BC), "conv1_2": conv_p(2 * BC, 2 * BC),
        "conv1_3": conv_p(2 * BC, 2 * BC),
        "conv2": conv_p(2 * BC, 4 * BC),
        "conv2_1": conv_p(4 * BC, 4 * BC), "conv2_2": conv_p(4 * BC, 4 * BC),
        "conv2_3": conv_p(4 * BC, 4 * BC),
        "conv3": deconv_p(4 * BC, 2 * BC),
        "conv4": deconv_p(2 * BC, BC),
        "prob": (0.1 * jax.random.normal(next(kit), (1, BC, 3, 3, 3), jnp.float32),),
    }
    x = jax.random.normal(next(kit), (N, C_IN, D, H, W), jnp.float32)

    prob, pro = costregnet_forward(x, params)
    prob, pro = jax.block_until_ready((prob, pro))

    prob_ref, pro_ref = reference_forward(x, params)
    assert prob.shape == (N, 1, D, H, W) and pro.shape == (N, BC, D, H, W)
    err_prob = float(jnp.max(jnp.abs(prob - prob_ref)))
    err_pro = float(jnp.max(jnp.abs(pro - pro_ref)))
    if not (err_prob < 5e-2 and err_pro < 5e-2):
        raise AssertionError(
            f"mismatch vs reference: prob max|err|={err_prob}, pro max|err|={err_pro}")
    print("KERNEL_OK")
</pallas_src>

<mosaic_0001>
module attributes {stable_mosaic.version = 11 : i64} {
  func.func @_conv_tap_kernel(%arg0: i32, %arg1: i32, %arg2: memref<1x1x4x342xbf16, #tpu.memory_space<vmem>>, %arg3: memref<1x1x4x342xbf16, #tpu.memory_space<vmem>>, %arg4: memref<1x1x4x342xbf16, #tpu.memory_space<vmem>>, %arg5: memref<8x108xbf16, #tpu.memory_space<vmem>>, %arg6: memref<1x288xf32, #tpu.memory_space<vmem>>, %arg7: memref<1x1x8x288xf32, #tpu.memory_space<vmem>>, %arg8: memref<1x1x8x1xf32, #tpu.memory_space<vmem>>, %arg9: memref<1x1x8x1xf32, #tpu.memory_space<vmem>>, %arg10: memref<108x288xbf16, #tpu.memory_space<vmem>>) attributes {dimension_semantics = [#tpu.dimension_semantics<parallel>, #tpu.dimension_semantics<parallel>], iteration_bounds = array<i64: 2, 8>, scalar_prefetch = 0 : i64, scratch_operands = 1 : i64, tpu.core_type = #tpu.core_type<tc>, window_params = [{transform_indices = @transform_0, window_bounds = array<i64: 1, 1, 4, 342>}, {transform_indices = @transform_1, window_bounds = array<i64: 1, 1, 4, 342>}, {transform_indices = @transform_2, window_bounds = array<i64: 1, 1, 4, 342>}, {pipeline_mode = #tpu.pipeline_mode<synchronous>, transform_indices = @transform_3, window_bounds = array<i64: 8, 108>}, {pipeline_mode = #tpu.pipeline_mode<synchronous>, transform_indices = @transform_4, window_bounds = array<i64: 1, 288>}, {transform_indices = @transform_5, window_bounds = array<i64: 1, 1, 8, 288>}, {transform_indices = @transform_6, window_bounds = array<i64: 1, 1, 8, 1>}, {transform_indices = @transform_7, window_bounds = array<i64: 1, 1, 8, 1>}]} {
    %c0 = arith.constant 0 : index
    %c0_0 = arith.constant 0 : index
    %0 = vector.load %arg5[%c0, %c0_0] : memref<8x108xbf16, #tpu.memory_space<vmem>>, vector<8x108xbf16>
    %cst = arith.constant 0.000000e+00 : f32
    %1 = vector.broadcast %cst : f32 to vector<8x1xf32>
    %cst_1 = arith.constant 0.000000e+00 : f32
    %2 = vector.broadcast %cst_1 : f32 to vector<8x1xf32>
    %c0_2 = arith.constant 0 : index
    %c0_3 = arith.constant 0 : index
    %c0_4 = arith.constant 0 : index
    %c0_5 = arith.constant 0 : index
    %3 = vector.load %arg2[%c0_2, %c0_3, %c0_4, %c0_5] : memref<1x1x4x342xbf16, #tpu.memory_space<vmem>>, vector<1x1x4x288xbf16>
    %4 = vector.shape_cast %3 : vector<1x1x4x288xbf16> to vector<4x288xbf16>
    %c0_6 = arith.constant 0 : index
    %c0_7 = arith.constant 0 : index
    %5 = vector.load %arg10[%c0_6, %c0_7] : memref<108x288xbf16, #tpu.memory_space<vmem>>, vector<4x288xbf16>
    tpu.vector_store %arg10[%c0_6, %c0_7], %4 {strides = array<i32>} : memref<108x288xbf16, #tpu.memory_space<vmem>>, vector<4x288xbf16>,
    %c0_8 = arith.constant 0 : index
    %c0_9 = arith.constant 0 : index
    %c0_10 = arith.constant 0 : index
    %c1 = arith.constant 1 : index
    %6 = vector.load %arg2[%c0_8, %c0_9, %c0_10, %c1] : memref<1x1x4x342xbf16, #tpu.memory_space<vmem>>, vector<1x1x4x288xbf16>
    %7 = vector.shape_cast %6 : vector<1x1x4x288xbf16> to vector<4x288xbf16>
    %c4 = arith.constant 4 : index
    %c0_11 = arith.constant 0 : index
    %8 = vector.load %arg10[%c4, %c0_11] : memref<108x288xbf16, #tpu.memory_space<vmem>>, vector<4x288xbf16>
    tpu.vector_store %arg10[%c4, %c0_11], %7 {strides = array<i32>} : memref<108x288xbf16, #tpu.memory_space<vmem>>, vector<4x288xbf16>,
    %c0_12 = arith.constant 0 : index
    %c0_13 = arith.constant 0 : index
    %c0_14 = arith.constant 0 : index
    %c2 = arith.constant 2 : index
    %9 = vector.load %arg2[%c0_12, %c0_13, %c0_14, %c2] : memref<1x1x4x342xbf16, #tpu.memory_space<vmem>>, vector<1x1x4x288xbf16>
    %10 = vector.shape_cast %9 : vector<1x1x4x288xbf16> to vector<4x288xbf16>
    %c8 = arith.constant 8 : index
    %c0_15 = arith.constant 0 : index
    %11 = vector.load %arg10[%c8, %c0_15] : memref<108x288xbf16, #tpu.memory_space<vmem>>, vector<4x288xbf16>
    tpu.vector_store %arg10[%c8, %c0_15], %10 {strides = array<i32>} : memref<108x288xbf16, #tpu.memory_space<vmem>>, vector<4x288xbf16>,
    %c0_16 = arith.constant 0 : index
    %c0_17 = arith.constant 0 : index
    %c0_18 = arith.constant 0 : index
    %c18 = arith.constant 18 : index
    %12 = vector.load %arg2[%c0_16, %c0_17, %c0_18, %c18] : memref<1x1x4x342xbf16, #tpu.memory_space<vmem>>, vector<1x1x4x288xbf16>
    %13 = vector.shape_cast %12 : vector<1x1x4x288xbf16> to vector<4x288xbf16>
    %c12 = arith.constant 12 : index
    %c0_19 = arith.constant 0 : index
    %14 = vector.load %arg10[%c12, %c0_19] : memref<108x288xbf16, #tpu.memory_space<vmem>>, vector<4x288xbf16>
    tpu.vector_store %arg10[%c12, %c0_19], %13 {strides = array<i32>} : memref<108x288xbf16, #tpu.memory_space<vmem>>, vector<4x288xbf16>,
    %c0_20 = arith.constant 0 : index
    %c0_21 = arith.constant 0 : index
    %c0_22 = arith.constant 0 : index
    %c19 = arith.constant 19 : index
    %15 = vector.load %arg2[%c0_20, %c0_21, %c0_22, %c19] : memref<1x1x4x342xbf16, #tpu.memory_space<vmem>>, vector<1x1x4x288xbf16>
    %16 = vector.shape_cast %15 : vector<1x1x4x288xbf16> to vector<4x288xbf16>
    %c16 = arith.constant 16 : index
    %c0_23 = arith.constant 0 : index
    %17 = vector.load %arg10[%c16, %c0_23] : memref<108x288xbf16, #tpu.memory_space<vmem>>, vector<4x288xbf16>
    tpu.vector_store %arg10[%c16, %c0_23], %16 {strides = array<i32>} : memref<108x288xbf16, #tpu.memory_space<vmem>>, vector<4x288xbf16>,
    %c0_24 = arith.constant 0 : index
    %c0_25 = arith.constant 0 : index
    %c0_26 = arith.constant 0 : index
    %c20 = arith.constant 20 : index
    %18 = vector.load %arg2[%c0_24, %c0_25, %c0_26, %c20] : memref<1x1x4x342xbf16, #tpu.memory_space<vmem>>, vector<1x1x4x288xbf16>
    %19 = vector.shape_cast %18 : vector<1x1x4x288xbf16> to vector<4x288xbf16>
    %c20_27 = arith.constant 20 : index
    %c0_28 = arith.constant 0 : index
    %20 = vector.load %arg10[%c20_27, %c0_28] : memref<108x288xbf16, #tpu.memory_space<vmem>>, vector<4x288xbf16>
    tpu.vector_store %arg10[%c20_27, %c0_28], %19 {strides = array<i32>} : memref<108x288xbf16, #tpu.memory_space<vmem>>, vector<4x288xbf16>,
    %c0_29 = arith.constant 0 : index
    %c0_30 = arith.constant 0 : index
    %c0_31 = arith.constant 0 : index
    %c36 = arith.constant 36 : index
    %21 = vector.load %arg2[%c0_29, %c0_30, %c0_31, %c36] : memref<1x1x4x342xbf16, #tpu.memory_space<vmem>>, vector<1x1x4x288xbf16>
    %22 = vector.shape_cast %21 : vector<1x1x4x288xbf16> to vector<4x288xbf16>
    %c24 = arith.constant 24 : index
    %c0_32 = arith.constant 0 : index
    %23 = vector.load %arg10[%c24, %c0_32] : memref<108x288xbf16, #tpu.memory_space<vmem>>, vector<4x288xbf16>
    tpu.vector_store %arg10[%c24, %c0_32], %22 {strides = array<i32>} : memref<108x288xbf16, #tpu.memory_space<vmem>>, vector<4x288xbf16>,
    %c0_33 = arith.constant 0 : index
    %c0_34 = arith.constant 0 : index
    %c0_35 = arith.constant 0 : index
    %c37 = arith.constant 37 : index
    %24 = vector.load %arg2[%c0_33, %c0_34, %c0_35, %c37] : memref<1x1x4x342xbf16, #tpu.memory_space<vmem>>, vector<1x1x4x288xbf16>
    %25 = vector.shape_cast %24 : vector<1x1x4x288xbf16> to vector<4x288xbf16>
    %c28 = arith.constant 28 : index
    %c0_36 = arith.constant 0 : index
    %26 = vector.load %arg10[%c28, %c0_36] : memref<108x288xbf16, #tpu.memory_space<vmem>>, vector<4x288xbf16>
    tpu.vector_store %arg10[%c28, %c0_36], %25 {strides = array<i32>} : memref<108x288xbf16, #tpu.memory_space<vmem>>, vector<4x288xbf16>,
    %c0_37 = arith.constant 0 : index
    %c0_38 = arith.constant 0 : index
    %c0_39 = arith.constant 0 : index
    %c38 = arith.constant 38 : index
    %27 = vector.load %arg2[%c0_37, %c0_38, %c0_39, %c38] : memref<1x1x4x342xbf16, #tpu.memory_space<vmem>>, vector<1x1x4x288xbf16>
    %28 = vector.shape_cast %27 : vector<1x1x4x288xbf16> to vector<4x288xbf16>
    %c32 = arith.constant 32 : index
    %c0_40 = arith.constant 0 : index
    %29 = vector.load %arg10[%c32, %c0_40] : memref<108x288xbf16, #tpu.memory_space<vmem>>, vector<4x288xbf16>
    tpu.vector_store %arg10[%c32, %c0_40], %28 {strides = array<i32>} : memref<108x288xbf16, #tpu.memory_space<vmem>>, vector<4x288xbf16>,
    %c0_41 = arith.constant 0 : index
    %c0_42 = arith.constant 0 : index
    %c0_43 = arith.constant 0 : index
    %c0_44 = arith.constant 0 : index
    %30 = vector.load %arg3[%c0_41, %c0_42, %c0_43, %c0_44] : memref<1x1x4x342xbf16, #tpu.memory_space<vmem>>, vector<1x1x4x288xbf16>
    %31 = vector.shape_cast %30 : vector<1x1x4x288xbf16> to vector<4x288xbf16>
    %c36_45 = arith.constant 36 : index
    %c0_46 = arith.constant 0 : index
    %32 = vector.load %arg10[%c36_45, %c0_46] : memref<108x288xbf16, #tpu.memory_space<vmem>>, vector<4x288xbf16>
    tpu.vector_store %arg10[%c36_45, %c0_46], %31 {strides = array<i32>} : memref<108x288xbf16, #tpu.memory_space<vmem>>, vector<4x288xbf16>,
    %c0_47 = arith.constant 0 : index
    %c0_48 = arith.constant 0 : index
    %c0_49 = arith.constant 0 : index
    %c1_50 = arith.constant 1 : index
    %33 = vector.load %arg3[%c0_47, %c0_48, %c0_49, %c1_50] : memref<1x1x4x342xbf16, #tpu.memory_space<vmem>>, vector<1x1x4x288xbf16>
    %34 = vector.shape_cast %33 : vector<1x1x4x288xbf16> to vector<4x288xbf16>
    %c40 = arith.constant 40 : index
    %c0_51 = arith.constant 0 : index
    %35 = vector.load %arg10[%c40, %c0_51] : memref<108x288xbf16, #tpu.memory_space<vmem>>, vector<4x288xbf16>
    tpu.vector_store %arg10[%c40, %c0_51], %34 {strides = array<i32>} : memref<108x288xbf16, #tpu.memory_space<vmem>>, vector<4x288xbf16>,
    %c0_52 = arith.constant 0 : index
    %c0_53 = arith.constant 0 : index
    %c0_54 = arith.constant 0 : index
    %c2_55 = arith.constant 2 : index
    %36 = vector.load %arg3[%c0_52, %c0_53, %c0_54, %c2_55] : memref<1x1x4x342xbf16, #tpu.memory_space<vmem>>, vector<1x1x4x288xbf16>
    %37 = vector.shape_cast %36 : vector<1x1x4x288xbf16> to vector<4x288xbf16>
    %c44 = arith.constant 44 : index
    %c0_56 = arith.constant 0 : index
    %38 = vector.load %arg10[%c44, %c0_56] : memref<108x288xbf16, #tpu.memory_space<vmem>>, vector<4x288xbf16>
    tpu.vector_store %arg10[%c44, %c0_56], %37 {strides = array<i32>} : memref<108x288xbf16, #tpu.memory_space<vmem>>, vector<4x288xbf16>,
    %c0_57 = arith.constant 0 : index
    %c0_58 = arith.constant 0 : index
    %c0_59 = arith.constant 0 : index
    %c18_60 = arith.constant 18 : index
    %39 = vector.load %arg3[%c0_57, %c0_58, %c0_59, %c18_60] : memref<1x1x4x342xbf16, #tpu.memory_space<vmem>>, vector<1x1x4x288xbf16>
    %40 = vector.shape_cast %39 : vector<1x1x4x288xbf16> to vector<4x288xbf16>
    %c48 = arith.constant 48 : index
    %c0_61 = arith.constant 0 : index
    %41 = vector.load %arg10[%c48, %c0_61] : memref<108x288xbf16, #tpu.memory_space<vmem>>, vector<4x288xbf16>
    tpu.vector_store %arg10[%c48, %c0_61], %40 {strides = array<i32>} : memref<108x288xbf16, #tpu.memory_space<vmem>>, vector<4x288xbf16>,
    %c0_62 = arith.constant 0 : index
    %c0_63 = arith.constant 0 : index
    %c0_64 = arith.constant 0 : index
    %c19_65 = arith.constant 19 : index
    %42 = vector.load %arg3[%c0_62, %c0_63, %c0_64, %c19_65] : memref<1x1x4x342xbf16, #tpu.memory_space<vmem>>, vector<1x1x4x288xbf16>
    %43 = vector.shape_cast %42 : vector<1x1x4x288xbf16> to vector<4x288xbf16>
    %c52 = arith.constant 52 : index
    %c0_66 = arith.constant 0 : index
    %44 = vector.load %arg10[%c52, %c0_66] : memref<108x288xbf16, #tpu.memory_space<vmem>>, vector<4x288xbf16>
    tpu.vector_store %arg10[%c52, %c0_66], %43 {strides = array<i32>} : memref<108x288xbf16, #tpu.memory_space<vmem>>, vector<4x288xbf16>,
    %c0_67 = arith.constant 0 : index
    %c0_68 = arith.constant 0 : index
    %c0_69 = arith.constant 0 : index
    %c20_70 = arith.constant 20 : index
    %45 = vector.load %arg3[%c0_67, %c0_68, %c0_69, %c20_70] : memref<1x1x4x342xbf16, #tpu.memory_space<vmem>>, vector<1x1x4x288xbf16>
    %46 = vector.shape_cast %45 : vector<1x1x4x288xbf16> to vector<4x288xbf16>
    %c56 = arith.constant 56 : index
    %c0_71 = arith.constant 0 : index
    %47 = vector.load %arg10[%c56, %c0_71] : memref<108x288xbf16, #tpu.memory_space<vmem>>, vector<4x288xbf16>
    tpu.vector_store %arg10[%c56, %c0_71], %46 {strides = array<i32>} : memref<108x288xbf16, #tpu.memory_space<vmem>>, vector<4x288xbf16>,
    %c0_72 = arith.constant 0 : index
    %c0_73 = arith.constant 0 : index
    %c0_74 = arith.constant 0 : index
    %c36_75 = arith.constant 36 : index
    %48 = vector.load %arg3[%c0_72, %c0_73, %c0_74, %c36_75] : memref<1x1x4x342xbf16, #tpu.memory_space<vmem>>, vector<1x1x4x288xbf16>
    %49 = vector.shape_cast %48 : vector<1x1x4x288xbf16> to vector<4x288xbf16>
    %c60 = arith.constant 60 : index
    %c0_76 = arith.constant 0 : index
    %50 = vector.load %arg10[%c60, %c0_76] : memref<108x288xbf16, #tpu.memory_space<vmem>>, vector<4x288xbf16>
    tpu.vector_store %arg10[%c60, %c0_76], %49 {strides = array<i32>} : memref<108x288xbf16, #tpu.memory_space<vmem>>, vector<4x288xbf16>,
    %c0_77 = arith.constant 0 : index
    %c0_78 = arith.constant 0 : index
    %c0_79 = arith.constant 0 : index
    %c37_80 = arith.constant 37 : index
    %51 = vector.load %arg3[%c0_77, %c0_78, %c0_79, %c37_80] : memref<1x1x4x342xbf16, #tpu.memory_space<vmem>>, vector<1x1x4x288xbf16>
    %52 = vector.shape_cast %51 : vector<1x1x4x288xbf16> to vector<4x288xbf16>
    %c64 = arith.constant 64 : index
    %c0_81 = arith.constant 0 : index
    %53 = vector.load %arg10[%c64, %c0_81] : memref<108x288xbf16, #tpu.memory_space<vmem>>, vector<4x288xbf16>
    tpu.vector_store %arg10[%c64, %c0_81], %52 {strides = array<i32>} : memref<108x288xbf16, #tpu.memory_space<vmem>>, vector<4x288xbf16>,
    %c0_82 = arith.constant 0 : index
    %c0_83 = arith.constant 0 : index
    %c0_84 = arith.constant 0 : index
    %c38_85 = arith.constant 38 : index
    %54 = vector.load %arg3[%c0_82, %c0_83, %c0_84, %c38_85] : memref<1x1x4x342xbf16, #tpu.memory_space<vmem>>, vector<1x1x4x288xbf16>
    %55 = vector.shape_cast %54 : vector<1x1x4x288xbf16> to vector<4x288xbf16>
    %c68 = arith.constant 68 : index
    %c0_86 = arith.constant 0 : index
    %56 = vector.load %arg10[%c68, %c0_86] : memref<108x288xbf16, #tpu.memory_space<vmem>>, vector<4x288xbf16>
    tpu.vector_store %arg10[%c68, %c0_86], %55 {strides = array<i32>} : memref<108x288xbf16, #tpu.memory_space<vmem>>, vector<4x288xbf16>,
    %c0_87 = arith.constant 0 : index
    %c0_88 = arith.constant 0 : index
    %c0_89 = arith.constant 0 : index
    %c0_90 = arith.constant 0 : index
    %57 = vector.load %arg4[%c0_87, %c0_88, %c0_89, %c0_90] : memref<1x1x4x342xbf16, #tpu.memory_space<vmem>>, vector<1x1x4x288xbf16>
    %58 = vector.shape_cast %57 : vector<1x1x4x288xbf16> to vector<4x288xbf16>
    %c72 = arith.constant 72 : index
    %c0_91 = arith.constant 0 : index
    %59 = vector.load %arg10[%c72, %c0_91] : memref<108x288xbf16, #tpu.memory_space<vmem>>, vector<4x288xbf16>
    tpu.vector_store %arg10[%c72, %c0_91], %58 {strides = array<i32>} : memref<108x288xbf16, #tpu.memory_space<vmem>>, vector<4x288xbf16>,
    %c0_92 = arith.constant 0 : index
    %c0_93 = arith.constant 0 : index
    %c0_94 = arith.constant 0 : index
    %c1_95 = arith.constant 1 : index
    %60 = vector.load %arg4[%c0_92, %c0_93, %c0_94, %c1_95] : memref<1x1x4x342xbf16, #tpu.memory_space<vmem>>, vector<1x1x4x288xbf16>
    %61 = vector.shape_cast %60 : vector<1x1x4x288xbf16> to vector<4x288xbf16>
    %c76 = arith.constant 76 : index
    %c0_96 = arith.constant 0 : index
    %62 = vector.load %arg10[%c76, %c0_96] : memref<108x288xbf16, #tpu.memory_space<vmem>>, vector<4x288xbf16>
    tpu.vector_store %arg10[%c76, %c0_96], %61 {strides = array<i32>} : memref<108x288xbf16, #tpu.memory_space<vmem>>, vector<4x288xbf16>,
    %c0_97 = arith.constant 0 : index
    %c0_98 = arith.constant 0 : index
    %c0_99 = arith.constant 0 : index
    %c2_100 = arith.constant 2 : index
    %63 = vector.load %arg4[%c0_97, %c0_98, %c0_99, %c2_100] : memref<1x1x4x342xbf16, #tpu.memory_space<vmem>>, vector<1x1x4x288xbf16>
    %64 = vector.shape_cast %63 : vector<1x1x4x288xbf16> to vector<4x288xbf16>
    %c80 = arith.constant 80 : index
    %c0_101 = arith.constant 0 : index
    %65 = vector.load %arg10[%c80, %c0_101] : memref<108x288xbf16, #tpu.memory_space<vmem>>, vector<4x288xbf16>
    tpu.vector_store %arg10[%c80, %c0_101], %64 {strides = array<i32>} : memref<108x288xbf16, #tpu.memory_space<vmem>>, vector<4x288xbf16>,
    %c0_102 = arith.constant 0 : index
    %c0_103 = arith.constant 0 : index
    %c0_104 = arith.constant 0 : index
    %c18_105 = arith.constant 18 : index
    %66 = vector.load %arg4[%c0_102, %c0_103, %c0_104, %c18_105] : memref<1x1x4x342xbf16, #tpu.memory_space<vmem>>, vector<1x1x4x288xbf16>
    %67 = vector.shape_cast %66 : vector<1x1x4x288xbf16> to vector<4x288xbf16>
    %c84 = arith.constant 84 : index
    %c0_106 = arith.constant 0 : index
    %68 = vector.load %arg10[%c84, %c0_106] : memref<108x288xbf16, #tpu.memory_space<vmem>>, vector<4x288xbf16>
    tpu.vector_store %arg10[%c84, %c0_106], %67 {strides = array<i32>} : memref<108x288xbf16, #tpu.memory_space<vmem>>, vector<4x288xbf16>,
    %c0_107 = arith.constant 0 : index
    %c0_108 = arith.constant 0 : index
    %c0_109 = arith.constant 0 : index
    %c19_110 = arith.constant 19 : index
    %69 = vector.load %arg4[%c0_107, %c0_108, %c0_109, %c19_110] : memref<1x1x4x342xbf16, #tpu.memory_space<vmem>>, vector<1x1x4x288xbf16>
    %70 = vector.shape_cast %69 : vector<1x1x4x288xbf16> to vector<4x288xbf16>
    %c88 = arith.constant 88 : index
    %c0_111 = arith.constant 0 : index
    %71 = vector.load %arg10[%c88, %c0_111] : memref<108x288xbf16, #tpu.memory_space<vmem>>, vector<4x288xbf16>
    tpu.vector_store %arg10[%c88, %c0_111], %70 {strides = array<i32>} : memref<108x288xbf16, #tpu.memory_space<vmem>>, vector<4x288xbf16>,
    %c0_112 = arith.constant 0 : index
    %c0_113 = arith.constant 0 : index
    %c0_114 = arith.constant 0 : index
    %c20_115 = arith.constant 20 : index
    %72 = vector.load %arg4[%c0_112, %c0_113, %c0_114, %c20_115] : memref<1x1x4x342xbf16, #tpu.memory_space<vmem>>, vector<1x1x4x288xbf16>
    %73 = vector.shape_cast %72 : vector<1x1x4x288xbf16> to vector<4x288xbf16>
    %c92 = arith.constant 92 : index
    %c0_116 = arith.constant 0 : index
    %74 = vector.load %arg10[%c92, %c0_116] : memref<108x288xbf16, #tpu.memory_space<vmem>>, vector<4x288xbf16>
    tpu.vector_store %arg10[%c92, %c0_116], %73 {strides = array<i32>} : memref<108x288xbf16, #tpu.memory_space<vmem>>, vector<4x288xbf16>,
    %c0_117 = arith.constant 0 : index
    %c0_118 = arith.constant 0 : index
    %c0_119 = arith.constant 0 : index
    %c36_120 = arith.constant 36 : index
    %75 = vector.load %arg4[%c0_117, %c0_118, %c0_119, %c36_120] : memref<1x1x4x342xbf16, #tpu.memory_space<vmem>>, vector<1x1x4x288xbf16>
    %76 = vector.shape_cast %75 : vector<1x1x4x288xbf16> to vector<4x288xbf16>
    %c96 = arith.constant 96 : index
    %c0_121 = arith.constant 0 : index
    %77 = vector.load %arg10[%c96, %c0_121] : memref<108x288xbf16, #tpu.memory_space<vmem>>, vector<4x288xbf16>
    tpu.vector_store %arg10[%c96, %c0_121], %76 {strides = array<i32>} : memref<108x288xbf16, #tpu.memory_space<vmem>>, vector<4x288xbf16>,
    %c0_122 = arith.constant 0 : index
    %c0_123 = arith.constant 0 : index
    %c0_124 = arith.constant 0 : index
    %c37_125 = arith.constant 37 : index
    %78 = vector.load %arg4[%c0_122, %c0_123, %c0_124, %c37_125] : memref<1x1x4x342xbf16, #tpu.memory_space<vmem>>, vector<1x1x4x288xbf16>
    %79 = vector.shape_cast %78 : vector<1x1x4x288xbf16> to vector<4x288xbf16>
    %c100 = arith.constant 100 : index
    %c0_126 = arith.constant 0 : index
    %80 = vector.load %arg10[%c100, %c0_126] : memref<108x288xbf16, #tpu.memory_space<vmem>>, vector<4x288xbf16>
    tpu.vector_store %arg10[%c100, %c0_126], %79 {strides = array<i32>} : memref<108x288xbf16, #tpu.memory_space<vmem>>, vector<4x288xbf16>,
    %c0_127 = arith.constant 0 : index
    %c0_128 = arith.constant 0 : index
    %c0_129 = arith.constant 0 : index
    %c38_130 = arith.constant 38 : index
    %81 = vector.load %arg4[%c0_127, %c0_128, %c0_129, %c38_130] : memref<1x1x4x342xbf16, #tpu.memory_space<vmem>>, vector<1x1x4x288xbf16>
    %82 = vector.shape_cast %81 : vector<1x1x4x288xbf16> to vector<4x288xbf16>
    %c104 = arith.constant 104 : index
    %c0_131 = arith.constant 0 : index
    %83 = vector.load %arg10[%c104, %c0_131] : memref<108x288xbf16, #tpu.memory_space<vmem>>, vector<4x288xbf16>
    tpu.vector_store %arg10[%c104, %c0_131], %82 {strides = array<i32>} : memref<108x288xbf16, #tpu.memory_space<vmem>>, vector<4x288xbf16>,
    %c0_132 = arith.constant 0 : index
    %c0_133 = arith.constant 0 : index
    %84 = vector.load %arg10[%c0_132, %c0_133] : memref<108x288xbf16, #tpu.memory_space<vmem>>, vector<108x288xbf16>
    %cst_134 = arith.constant dense<0.000000e+00> : vector<8x288xf32>
    %85 = tpu.matmul %0, %84, %cst_134 {dimension_numbers = #tpu.dot_dimension_numbers<[1], [0], [0], [1], [0, 0, 1, 1], [], []>} : vector<8x108xbf16>, vector<108x288xbf16>, vector<8x288xf32> -> vector<8x288xf32>
    %c0_135 = arith.constant 0 : index
    %c0_136 = arith.constant 0 : index
    %86 = vector.load %arg6[%c0_135, %c0_136] : memref<1x288xf32, #tpu.memory_space<vmem>>, vector<1x288xf32>
    %87 = vector.broadcast %86 : vector<1x288xf32> to vector<8x288xf32>
    %88 = arith.mulf %85, %87 : vector<8x288xf32>
    %c0_137 = arith.constant 0 : index
    %c0_138 = arith.constant 0 : index
    %c0_139 = arith.constant 0 : index
    %c0_140 = arith.constant 0 : index
    %89 = vector.load %arg7[%c0_137, %c0_138, %c0_139, %c0_140] : memref<1x1x8x288xf32, #tpu.memory_space<vmem>>, vector<1x1x8x288xf32>
    %90 = vector.shape_cast %89 : vector<1x1x8x288xf32> to vector<8x288xf32>
    %91 = vector.shape_cast %88 : vector<8x288xf32> to vector<1x1x8x288xf32>
    tpu.vector_store %arg7[%c0_137, %c0_138, %c0_139, %c0_140], %91 {strides = array<i32>} : memref<1x1x8x288xf32, #tpu.memory_space<vmem>>, vector<1x1x8x288xf32>,
    %cst_141 = arith.constant dense<0.000000e+00> : vector<8xf32>
    %92 = vector.multi_reduction <add>, %88, %cst_141 [1] : vector<8x288xf32> to vector<8xf32>
    %93 = vector.shape_cast %92 : vector<8xf32> to vector<8x1xf32>
    %94 = arith.addf %1, %93 : vector<8x1xf32>
    %95 = arith.mulf %88, %88 : vector<8x288xf32>
    %cst_142 = arith.constant dense<0.000000e+00> : vector<8xf32>
    %96 = vector.multi_reduction <add>, %95, %cst_142 [1] : vector<8x288xf32> to vector<8xf32>
    %97 = vector.shape_cast %96 : vector<8xf32> to vector<8x1xf32>
    %98 = arith.addf %2, %97 : vector<8x1xf32>
    %c0_143 = arith.constant 0 : index
    %c0_144 = arith.constant 0 : index
    %c0_145 = arith.constant 0 : index
    %c0_146 = arith.constant 0 : index
    %99 = vector.load %arg8[%c0_143, %c0_144, %c0_145, %c0_146] : memref<1x1x8x1xf32, #tpu.memory_space<vmem>>, vector<1x1x8x1xf32>
    %100 = vector.shape_cast %99 : vector<1x1x8x1xf32> to vector<8x1xf32>
    %101 = vector.shape_cast %94 : vector<8x1xf32> to vector<1x1x8x1xf32>
    tpu.vector_store %arg8[%c0_143, %c0_144, %c0_145, %c0_146], %101 {strides = array<i32>} : memref<1x1x8x1xf32, #tpu.memory_space<vmem>>, vector<1x1x8x1xf32>,
    %c0_147 = arith.constant 0 : index
    %c0_148 = arith.constant 0 : index
    %c0_149 = arith.constant 0 : index
    %c0_150 = arith.constant 0 : index
    %102 = vector.load %arg9[%c0_147, %c0_148, %c0_149, %c0_150] : memref<1x1x8x1xf32, #tpu.memory_space<vmem>>, vector<1x1x8x1xf32>
    %103 = vector.shape_cast %102 : vector<1x1x8x1xf32> to vector<8x1xf32>
    %104 = vector.shape_cast %98 : vector<8x1xf32> to vector<1x1x8x1xf32>
    tpu.vector_store %arg9[%c0_147, %c0_148, %c0_149, %c0_150], %104 {strides = array<i32>} : memref<1x1x8x1xf32, #tpu.memory_space<vmem>>, vector<1x1x8x1xf32>,
    return
  }
  func.func @transform_0(%arg0: i32, %arg1: i32) -> (i32, i32, i32, i32) {
    %c0_i32 = arith.constant 0 : i32
    %c0_i32_0 = arith.constant 0 : i32
    %c0_i32_1 = arith.constant 0 : i32
    return %arg0, %arg1, %c0_i32, %c0_i32_0 : i32, i32, i32, i32
  }
  func.func @transform_1(%arg0: i32, %arg1: i32) -> (i32, i32, i32, i32) {
    %c1_i32 = arith.constant 1 : i32
    %0 = arith.addi %arg1, %c1_i32 : i32
    %c0_i32 = arith.constant 0 : i32
    %c0_i32_0 = arith.constant 0 : i32
    %c0_i32_1 = arith.constant 0 : i32
    return %arg0, %0, %c0_i32, %c0_i32_0 : i32, i32, i32, i32
  }
  func.func @transform_2(%arg0: i32, %arg1: i32) -> (i32, i32, i32, i32) {
    %c2_i32 = arith.constant 2 : i32
    %0 = arith.addi %arg1, %c2_i32 : i32
    %c0_i32 = arith.constant 0 : i32
    %c0_i32_0 = arith.constant 0 : i32
    %c0_i32_1 = arith.constant 0 : i32
    return %arg0, %0, %c0_i32, %c0_i32_0 : i32, i32, i32, i32
  }
  func.func @transform_3(%arg0: i32, %arg1: i32) -> (i32, i32) {
    %c0_i32 = arith.constant 0 : i32
    %c0_i32_0 = arith.constant 0 : i32
    %c0_i32_1 = arith.constant 0 : i32
    return %c0_i32, %c0_i32_0 : i32, i32
  }
  func.func @transform_4(%arg0: i32, %arg1: i32) -> (i32, i32) {
    %c0_i32 = arith.constant 0 : i32
    %c0_i32_0 = arith.constant 0 : i32
    %c0_i32_1 = arith.constant 0 : i32
    return %c0_i32, %c0_i32_0 : i32, i32
  }
  func.func @transform_5(%arg0: i32, %arg1: i32) -> (i32, i32, i32, i32) {
    %c0_i32 = arith.constant 0 : i32
    %c0_i32_0 = arith.constant 0 : i32
    %c0_i32_1 = arith.constant 0 : i32
    return %arg0, %arg1, %c0_i32, %c0_i32_0 : i32, i32, i32, i32
  }
  func.func @transform_6(%arg0: i32, %arg1: i32) -> (i32, i32, i32, i32) {
    %c0_i32 = arith.constant 0 : i32
    %c0_i32_0 = arith.constant 0 : i32
    %c0_i32_1 = arith.constant 0 : i32
    return %arg0, %arg1, %c0_i32, %c0_i32_0 : i32, i32, i32, i32
  }
  func.func @transform_7(%arg0: i32, %arg1: i32) -> (i32, i32, i32, i32) {
    %c0_i32 = arith.constant 0 : i32
    %c0_i32_0 = arith.constant 0 : i32
    %c0_i32_1 = arith.constant 0 : i32
    return %arg0, %arg1, %c0_i32, %c0_i32_0 : i32, i32, i32, i32
  }
}

</mosaic_0001>

<bundles_post_ra>
// kernel: tpu_custom_call.1
= control target key start
LH: loop header
LB: loop body
LE: loop exit
PB: predicated region body
PF: predicated region fallthrough
CT: control target
= control target key end

     0   :  { %s2889_s0 = inlined_call_operand.hbm [shape: bf16[2,10,4,342], index: 0, kind: input, shape index: {}]   ;;  %s2890_s1 = inlined_call_operand.hbm [shape: bf16[2,10,4,342], index: 1, kind: input, shape index: {}]   ;;  %s2891_s2 = inlined_call_operand.hbm [shape: bf16[2,10,4,342], index: 2, kind: input, shape index: {}]   ;;  %s2892_s3 = inlined_call_operand.vmem [shape: bf16[8,108], index: 3, kind: input, shape index: {}]   ;;  %s2893_s4 = inlined_call_operand.vmem [shape: f32[1,288], index: 4, kind: input, shape index: {}]   ;;  %s2894_s5 = inlined_call_operand.hbm [shape: f32[2,8,8,288], index: 5, kind: output, shape index: {0}]   ;;  %s2895_s6 = inlined_call_operand.vmem [shape: f32[2,8,8,1], index: 6, kind: output, shape index: {1}]   ;;  %s2896_s7 = inlined_call_operand.vmem [shape: f32[2,8,8,1], index: 7, kind: output, shape index: {2}]  }
   0x1   :  { %2908 = sst [smem:[#allocation22_spill]] %s2889_s0 }
   0x2   :  { %2909 = sst [smem:[#allocation23_spill]] %s2890_s1 }
   0x3   :  { %2910 = sst [smem:[#allocation24_spill]] %s2891_s2 }
   0x4   :  { %2911 = sst [smem:[#allocation25_spill]] %s2892_s3 }
   0x5   :  { %2912 = sst [smem:[#allocation26_spill]] %s2893_s4 }
   0x6   :  { %2913 = sst [smem:[#allocation27_spill]] %s2894_s5 }
   0x7   :  { %2914 = sst [smem:[#allocation28_spill]] %s2895_s6 }
   0x8   :  { %2915 = sst [smem:[#allocation29_spill]] %s2896_s7 }
   0x9   :  { %13 = vsyncpa [#allocation4], 0 }
   0xa   :  { %15 = vsyncpa [#allocation4 + $0x1], 0 }
   0xb   :  { %16 = vsyncpa [#allocation7], 0 }
   0xc   :  { %18 = vsyncpa [#allocation7 + $0x1], 0 }
   0xd   :  { %19 = vsyncpa [#allocation5], 0 }
   0xe   :  { %21 = vsyncpa [#allocation5 + $0x1], 0  ;;  %s2315_s24 = smov 0   ;;  %s2317_s25 = smov 0  }
   0xf   :  { %s2319_s26 = smov 0   ;;  %s2321_s27 = smov 0  }
  0x10   :  { %s2323_s28 = smov 0   ;;  %s2325_s29 = smov 0  }
  0x11   :  { %s2327_s30 = smov 0   ;;  %s2329_s8 = smov 0  }
  0x12   :  { %s2331_s9 = smov 0   ;;  %s2333_s10 = smov 0  }
  0x13   :  { %s2335_s11 = smov 0   ;;  %s2337_s12 = smov 0  }
  0x14   :  { %s2339_s13 = smov 0   ;;  %s2341_s14 = smov 0  }
  0x15 LB: > { %2916 = sst [smem:[#allocation14_spill]] %s2205_s24  ;;  %s2386_s15 = sadd.s32 4294967295, %s2257_s14   ;;  %s2257_s14 = sphi %s2341_s14, %s27_s14   ;;  %s2253_s13 = sphi %s2339_s13, %s2958_s13   ;;  %s2249_s12 = sphi %s2337_s12, %s2957_s12   ;;  %s2245_s11 = sphi %s2335_s11, %s2968_s11   ;;  %s2241_s10 = sphi %s2333_s10, %s2955_s10   ;;  %s2237_s9 = sphi %s2331_s9, %s2967_s9   ;;  %s2233_s8 = sphi %s2329_s8, %s2966_s8   ;;  %s2229_s30 = sphi %s2327_s30, %s2965_s30   ;;  %s2225_s29 = sphi %s2325_s29, %s2964_s29   ;;  %s2221_s28 = sphi %s2323_s28, %s2963_s28   ;;  %s2217_s27 = sphi %s2321_s27, %s2954_s27   ;;  %s2213_s26 = sphi %s2319_s26, %s2962_s26   ;;  %s2209_s25 = sphi %s2317_s25, %s2961_s25   ;;  %s2205_s24 = sphi %s2315_s24, %s2960_s24  }
  0x16   : > { %2917 = sst [smem:[#allocation15_spill]] %s2221_s28  ;;  %s36_s16 = sadd.s32 1, %s2249_s12 }
  0x17   : > { %2918 = sst [smem:[#allocation16_spill]] %s2241_s10  ;;  %p37_p0 = scmp.ge.s32.totalorder %s36_s16, 8 }
  0x18   : > { %2919 = sst [smem:[#allocation17_spill]] %s2245_s11  ;;  %s39_s17 = sadd.s32 1, %s2253_s13 }
  0x19   : > { %2920 = sst [smem:[#allocation18_spill]] %s2249_s12  ;;  %p2905_p1 = scmp.eq.s32.totalorder %s2257_s14, 0 }
  0x1a   : > { %2921 = sst [smem:[#allocation19_spill]] %s2253_s13  ;;  %p2904_p2 = scmp.eq.s32.totalorder %s2386_s15, 0 }
  0x1b   : > { %s2392_s18 = scalar_select %p37_p0, 0, %s36_s16  }
  0x1c   : > { %s2970_s17 = smov (!%p37_p0, %s39_s17), %s2253_s13  ;;  %s78_s22 = sadd.s32 1, %s2225_s29 }
  0x1d   : > { %2922 = sst [smem:[#allocation20_spill]] %s2392_s18  ;;  %s72_s20 = sadd.s32 1, %s2392_s18 }
  0x1e   : > { %p41_p3 = scmp.ge.s32.totalorder %s2970_s17, 2  ;;  %s74_s21 = ssub.s32 %s36_s16, %s72_s20 }
  0x1f   : > { %p85_p4 = scmp.ne.s32.totalorder %s2225_s29, %s2221_s28  ;;  %p91_p6 = scmp.ne.s32.totalorder %s2221_s28, %s2217_s27 }
  0x20   : > { %s2972_s17 = smov (%p41_p3, %s2970_s17), 0  ;;  %s101_s16 = sadd.s32 2, %s2249_s12 }
  0x21   : > { %2923 = sst [smem:[#allocation21_spill]] %s2972_s17  ;;  %p2405_p5 = por %p85_p4, %p2905_p1 }
  0x22   : > { %s2413_s19 = ssub.s32 %s2253_s13, %s2972_s17  ;;  %p2419_p7 = por %p91_p6, %p2904_p2 }
  0x23   : > { %s75_s20 = sor.u32 %s74_s21, %s2413_s19  ;;  %s102_s6 = sadd.s32 2, %s2392_s18 }
  0x24   : > { %p76_p8 = scmp.eq.s32.totalorder %s75_s20, 0  ;;  %s104_s5 = ssub.s32 %s101_s16, %s102_s6 }
  0x25   : > { %s105_s10 = sor.u32 %s104_s5, %s2413_s19  ;;  %p2903_p9 = scmp.lt.s32.totalorder %s2257_s14, 16 }
  0x26   : > { %s2425_s11 = scalar_select %p76_p8, %s2225_s29, %s78_s22  }
  0x27   : > { %p2429_p10 = scmp.eq.s32.totalorder %s105_s10, 0  ;;  %s1807_s17 = smul.u32 3, %s2249_s12 }
  0x28   : > { %s1808_s21 = smul.u32 30, %s2253_s13  ;;  %s298_s4 = sand.u32 1, %s2257_s14  }
  0x29   : > { %s300_s3 = sand.u32 1, %s2225_s29   ;;  %p2443_p11 = pnand %p2903_p9, %p2405_p5 }
  0x2a   : > { %s287_s28 = sadd.s32 %s1808_s21, %s1807_s17  ;;  %s1809_s2 = smul.u32 6, %s300_s3 }
  0x2b   : > { %s2437_s24 = sshll.u32 %s287_s28, 5  ;;  %s2928_s1 = sld [smem:[#allocation23_spill]] }
  0x2c   : > { %s302_s20 = scalar_lea.vmem [#allocation6], %s1809_s2  ;;  %s2451_s17 = scalar_lea.sflag [#allocation7], %s298_s4 }
  0x2d   : > { %s313_s13 = sshll.u32 %s302_s20, 4  ;;  %p2021_p12 = pneg %p2443_p11  ;;  %s314_s13 = int_to_ptr.vmem [resolvable:$true] %s313_s13 }
  0x2e   : > { %s2032_s3 = scalar_lea.vmem %s314_s13, 96  ;;  %s2259_s28 = smov [#allocation6]  }
  0x2f   : > { %p2033_p13 = scmp.ne.s32.totalorder %s314_s13, %s2032_s3  ;;  %s2037_s23 = sshll.u32 %s2259_s28, 4  ;;  %s2038_s23 = int_to_ptr.vmem [resolvable:$false] %s2037_s23 }
  0x30   : > { %s2039_s21 = scalar_lea.vmem %s2038_s23, 192  ;;  %p2040_p4 = scmp.lt.s32.totalorder %s314_s13, %s2038_s23 }
  0x31   : > { %s1592_s22 = scalar_lea.hbm %s2928_s1, %s2437_s24  ;;  %p2035_p0 = pnand %p2033_p13, %p2021_p12 }
  0x32   : > { %s1593_s16 = scalar_lea.hbm %s1592_s22, 96  ;;  %p2041_p5 = scmp.lt.s32.totalorder %s2039_s21, %s2032_s3 }
  0x33   : > { %p2036_p3 = pneg %p2035_p0 }
  0x34   : > { %p2042_p6 = por %p2041_p5, %p2040_p4 }
  0x36   : > { %p2043_p8 = pnand %p2042_p6, %p2036_p3 }
  0x38   : > { %2046 = shalt.err (!%p2043_p8)
}
  0x39   : > { %1831 = dma.hbm_to_vmem [thread:$0]  (!%p2443_p11), %s1593_s16, 96, %s314_s13, %s2451_s17  }
  0x3a   : > { %p1745_p12 = scmp.ge.s32.totalorder %s2257_s14, 1  ;;  %p340_p13 = scmp.lt.s32.totalorder %s2257_s14, 17 }
  0x3b   : > { %s1739_s4 = sadd.s32 4294967294, %s2257_s14   ;;  %s2930_s6 = ssub.s32 %s2249_s12, %s2392_s18 }
  0x3c   : > { %p2460_p0 = pnand %p1745_p12, %p340_p13  ;;  %s45_s5 = sor.u32 %s2930_s6, %s2413_s19 }
  0x3d   : > { %s48_s10 = sadd.s32 1, %s2237_s9  ;;  %p46_p3 = scmp.eq.s32.totalorder %s45_s5, 0 }
  0x3e   : > { %p55_p4 = scmp.ne.s32.totalorder %s2237_s9, %s2233_s8  ;;  %p61_p5 = scmp.ne.s32.totalorder %s2233_s8, %s2229_s30 }
  0x3f   : > { %p189_p6 = scmp.eq.s32.totalorder %s2386_s15, 15  ;;  %p195_p13 = scmp.eq.s32.totalorder %s1739_s4, 15 }
  0x40   : > { %s2476_s22 = scalar_select %p46_p3, %s2237_s9, %s48_s10  }
  0x41   : > { %p57_p11 = por %p2905_p1, %p55_p4  ;;  %p2482_p8 = por %p2904_p2, %p61_p5 }
  0x42   : > { %p2486_p12 = por %p189_p6, %p55_p4  ;;  %s277_s19 = sand.u32 1, %s2237_s9  }
  0x43   : > { %s2933_s0 = sld [smem:[#allocation22_spill]]  ;;  %p2495_p9 = por %p195_p13, %p61_p5 }
  0x44   : > { %s1806_s21 = smul.u32 6, %s277_s19  ;;  %p2935_p3 = scmp.lt.s32.totalorder %s2257_s14, 16 }
  0x45   : > { %s2934_s23 = scalar_select %p2495_p9, 1, 0 }
  0x46   : > { %p2501_p2 = pnand %p2935_p3, %p57_p11  ;;  %s281_s5 = scalar_lea.vmem [#allocation3], %s1806_s21 }
  0x47   : > { %s291_s10 = sshll.u32 %s281_s5, 4  ;;  %s278_s4 = scalar_lea.sflag [#allocation4], %s277_s19  ;;  %s292_s10 = int_to_ptr.vmem [resolvable:$true] %s291_s10 }
  0x48   : > { %p2050_p4 = pneg %p2501_p2  ;;  %s2061_s1 = scalar_lea.vmem %s292_s10, 96 }
  0x49   : > { %s289_s28 = scalar_lea.hbm %s2933_s0, %s2437_s24  ;;  %p2062_p6 = scmp.ne.s32.totalorder %s292_s10, %s2061_s1 }
  0x4a   : > { %s2260_s20 = smov [#allocation3]  }
  0x4b   : > { %p2064_p1 = pnand %p2062_p6, %p2050_p4  ;;  %s2066_s3 = sshll.u32 %s2260_s20, 4  ;;  %s2067_s3 = int_to_ptr.vmem [resolvable:$false] %s2066_s3 }
  0x4c   : > { %s2068_s0 = scalar_lea.vmem %s2067_s3, 192  ;;  %p2069_p13 = scmp.lt.s32.totalorder %s292_s10, %s2067_s3 }
  0x4d   : > { %p2065_p5 = pneg %p2064_p1  ;;  %p2070_p11 = scmp.lt.s32.totalorder %s2068_s0, %s2061_s1 }
  0x4f   : > { %p2071_p3 = por %p2070_p11, %p2069_p13 }
  0x51   : > { %p2072_p9 = pnand %p2071_p3, %p2065_p5 }
  0x53   : > { %2075 = shalt.err (!%p2072_p9)
}
  0x54   : > { %s2937_s19 = sld [smem:[#allocation14_spill]]  ;;  %s108_s21 = sadd.s32 1, %s2213_s26 }
  0x55   : > { %1828 = dma.hbm_to_vmem [thread:$0]  (!%p2501_p2), %s289_s28, 96, %s292_s10, %s278_s4  }
  0x56   : > { %p115_p1 = scmp.ne.s32.totalorder %s2213_s26, %s2209_s25  ;;  %p2938_p9 = scmp.eq.s32.totalorder %s2257_s14, 0 }
  0x57   : > { %s2515_s0 = scalar_select %p2429_p10, %s2213_s26, %s108_s21  }
  0x58   : > { %p117_p4 = por %p115_p1, %p2938_p9  ;;  %s322_s1 = sand.u32 1, %s2213_s26  }
  0x59   : > { %s2939_s20 = sld [smem:[#allocation24_spill]]  ;;  %p2940_p5 = scmp.eq.s32.totalorder %s2386_s15, 0 }
  0x5a   : > { %p121_p6 = scmp.ne.s32.totalorder %s2209_s25, %s2937_s19  ;;  %s1810_s12 = smul.u32 6, %s322_s1 }
  0x5b   : > { %p2942_p2 = scmp.lt.s32.totalorder %s2257_s14, 16 }
  0x5c   : > { %p2528_p13 = por %p121_p6, %p2940_p5  ;;  %s324_s10 = scalar_lea.vmem [#allocation8], %s1810_s12 }
  0x5d   : > { %p2534_p11 = pnand %p2942_p2, %p117_p4  ;;  %s335_s4 = sshll.u32 %s324_s10, 4  ;;  %s336_s4 = int_to_ptr.vmem [resolvable:$true] %s335_s4 }
  0x5e   : > { %s2089_s19 = scalar_lea.vmem %s336_s4, 96 }
  0x5f   : > { %s1601_s3 = scalar_lea.hbm %s2939_s20, %s2437_s24  ;;  %p2078_p10 = pneg %p2534_p11 }
  0x60   : > { %s1602_s27 = scalar_lea.hbm %s1601_s3, 192  ;;  %p2090_p3 = scmp.ne.s32.totalorder %s336_s4, %s2089_s19 }
  0x61   : > { %s2261_s24 = smov [#allocation8]  }
  0x62   : > { %p2092_p1 = pnand %p2090_p3, %p2078_p10  ;;  %s2094_s21 = sshll.u32 %s2261_s24, 4  ;;  %s2095_s21 = int_to_ptr.vmem [resolvable:$false] %s2094_s21 }
  0x63   : > { %s2096_s1 = scalar_lea.vmem %s2095_s21, 192  ;;  %p2097_p6 = scmp.lt.s32.totalorder %s336_s4, %s2095_s21 }
  0x64   : > { %p2093_p9 = pneg %p2092_p1  ;;  %p2098_p4 = scmp.lt.s32.totalorder %s2096_s1, %s2089_s19 }
  0x66   : > { %p2099_p5 = por %p2098_p4, %p2097_p6 }
  0x68   : > { %p2100_p2 = pnand %p2099_p5, %p2093_p9 }
  0x6a   : > { %2103 = shalt.err (!%p2100_p2)
}
  0x6b   : > { %1834 = dma.hbm_to_vmem [thread:$0]  (!%p2534_p11), %s1602_s27, 96, %s336_s4, %s2451_s17  }
  0x6c   : > { %344 = sbr.rel (%p2460_p0) target bundleno = 704 (0x2c0), region = 40  ;;  %s2546_s12 = sand.u32 (!%p2460_p0), 1, %s2233_s8  }
  0x6d   : > { %s1811_s6 = smul.u32 (!%p2460_p0), 6, %s2546_s12  ;;  %s347_s5 = scalar_lea.sflag (!%p2460_p0), [#allocation4], %s2546_s12 }
  0x6f   : > { %s2550_s20 = scalar_lea.vmem (!%p2460_p0), [#allocation3], %s1811_s6 }
  0x71   : > { %2188 = dma.done.wait (%p2482_p8), %s347_s5, 96  }
  0x72   : > { %2190 = vsyncadd (%p2482_p8), %s347_s5, 4294967200  ;;  %s2944_s17 = sld [smem:[#allocation15_spill]]  ;;  %s355_s2 = sand.u32 1, %s2386_s15  }
  0x73   : > { %s356_s27 = scalar_lea.sflag [#allocation7], %s355_s2 }
  0x78   : > { %s357_s3 = sand.u32 1, %s2944_s17  }
  0x79   : > { %s1812_s28 = smul.u32 6, %s357_s3 }
  0x7b   : > { %s2558_s10 = scalar_lea.vmem [#allocation6], %s1812_s28 }
  0x7c   : > { %2192 = dma.done.wait (%p2419_p7), %s356_s27, 96  }
  0x7d   : > { %2194 = vsyncadd (%p2419_p7), %s356_s27, 4294967200  ;;  %s366_s4 = sand.u32 1, %s2209_s25  }
  0x7e   : > { %s1813_s19 = smul.u32 6, %s366_s4 }
  0x80   : > { %s2565_s13 = scalar_lea.vmem [#allocation8], %s1813_s19 }
  0x81   : > { %2196 = dma.done.wait (%p2528_p13), %s356_s27, 96  }
  0x82   : > { %2198 = vsyncadd (%p2528_p13), %s356_s27, 4294967200  ;;  %v458_v0 = vlaneseq  ;;  %v2262_v1 = vmov 1983009808   ;;  %v1157_v6 = vld [vmem:[%s2565_s13] sm:$0x3f]  ;;  %s2263_s7 = smov 91  }
  0x83   : > { %v456_v2 = vunpack.c.l.s4 %v2262_v1  ;;  %v1128_v7 = vld [vmem:[%s2565_s13] sm:$0x3f]  ;;  %v1159_v10 = vcombine.low %v1157_v6, %v1157_v6  ;;  %s2264_s15 = smov 92   ;;  %s2265_s18 = smov 90   ;;  %v904_v32 = vld [vmem:[%s2558_s10] sm:$0x3f] }
  0x84   : > { %v2571_v3 = vshrl.u32 %v458_v0, 7  ;;  %v1186_v8 = vld [vmem:[%s2565_s13] sm:$0x3f]  ;;  %v1130_v16 = vcombine.high %v1128_v7, %v1128_v7  ;;  %s2266_s24 = smov 126   ;;  %s2267_s21 = smov 110   ;;  %v2268_v33 = vmov 0.0   ;;  %v906_v37 = vcombine.high %v904_v32, %v904_v32 }
  0x85   : > { %v457_v4 = vunpack.c.0.s8 %v456_v2  ;;  %v1188_v14 = vcombine.high %v1186_v8, %v1186_v8  ;;  %v1012_v15 = vld [vmem:[%s2565_s13] sm:$0x3f]  ;;  %1788 = vmatprep.subr.bf16.mxu1 %v2268_v33  ;;  %s2269_s1 = smov 109   ;;  %v933_v39 = vld [vmem:[%s2558_s10] sm:$0x3f]  ;;  %vm465_vm0 = vcmask 254976  }
  0x86   : > { %v1014_v19 = vcombine.high %v1012_v15, %v1012_v15  ;;  %v1041_v20 = vld [vmem:[%s2565_s13] sm:$0x3f]  ;;  %s2270_s6 = smov 108   ;;  %v935_v43 = vcombine.low %v933_v39, %v933_v39  ;;  %v788_v48 = vld [vmem:[%s2558_s10] sm:$0x3f]  ;;  %s2271_s5 = smov 127  }
  0x87   : > { %v2574_v5 = vsub.s32 %v457_v4, %v2571_v3  ;;  %v1043_v23 = vcombine.low %v1041_v20, %v1041_v20  ;;  %v1070_v24 = vld [vmem:[%s2565_s13] sm:$0x3f]  ;;  %v790_v51 = vcombine.high %v788_v48, %v788_v48  ;;  %v817_v52 = vld [vmem:[%s2558_s10] sm:$0x3f]  ;;  %vm497_vm1 = vcmask 257026   ;;  %s2945_s2 = sld [smem:[#allocation25_spill]] }
  0x88   : > { %v1072_v27 = vcombine.high %v1070_v24, %v1070_v24  ;;  %v1099_v28 = vld [vmem:[%s2565_s13] sm:$0x3f]  ;;  %v819_v55 = vcombine.low %v817_v52, %v817_v52  ;;  %v846_v56 = vld [vmem:[%s2558_s10] sm:$0x3f]  ;;  %v679_v2 = vld [vmem:[%s2550_s20] sm:$0x3f] }
  0x89   : > { %v1173_v9 = vrot.slane %v1157_v6, %v2574_v5  ;;  %v1137_v11 = vrot.slane %v1128_v7, %v2574_v5  ;;  %v1166_v12 = vrot.slane %v1159_v10, %v2574_v5  ;;  %v1195_v13 = vrot.slane %v1186_v8, %v2574_v5  ;;  %v962_v35 = vld [vmem:[%s2565_s13] sm:$0x3f]  ;;  %v875_v60 = vld [vmem:[%s2558_s10] sm:$0x3f]  ;;  %s2946_s27 = sld [smem:[#allocation26_spill]]  ;;  %s1490_s17 = scalar_lea.sflag [#allocation5], %s2546_s12 }
  0x8a   : > { %v1202_v17 = vrot.slane %v1188_v14, %v2574_v5  ;;  %v1021_v18 = vrot.slane %v1012_v15, %v2574_v5  ;;  %v1144_v21 = vrot.slane %v1130_v16, %v2574_v5  ;;  %v1028_v22 = vrot.slane %v1014_v19, %v2574_v5  ;;  %1752 = vst.sshfl [vmem:[#allocation2 + $0x6c] sm:$0xf pattern:$0x76325410] %v962_v35  ;;  %v983_v44 = vld [vmem:[%s2565_s13] sm:$0x3f] }
  0x8b   : > { %1176 = vrot.lane.b32.xlu1 %v1173_v9, %s2263_s7  ;;  %1145 = vrot.lane.b32.xlu0 %v1137_v11, %s2264_s15  ;;  %v1050_v25 = vrot.slane %v1043_v23, %v2574_v5  ;;  %v1057_v26 = vrot.slane %v1041_v20, %v2574_v5  ;;  %v1079_v29 = vrot.slane %v1070_v24, %v2574_v5  ;;  %v709_v61 = vld [vmem:[%s2558_s10] sm:$0x3f]  ;;  %vm2272_vm2 = vmmov 0   ;;  %s2947_s19 = sld [smem:[#allocation16_spill]]  ;;  %s2274_s3 = smov [#allocation9]  }
  0x8c   : > { %v1086_v30 = vrot.slane %v1072_v27, %v2574_v5  ;;  %v1101_v31 = vcombine.low %v1099_v28, %v1099_v28  ;;  %v1115_v34 = vrot.slane %v1099_v28, %v2574_v5  ;;  %v964_v38 = vcombine.high %v962_v35, %v962_v35  ;;  %v730_v9 = vld [vmem:[%s2558_s10] sm:$0x3f]  ;;  %v445_v27 = vld [vmem:[%s2550_s20] sm:$0x3f]  ;;  %1802 = vmatprep.mubr.msk.bf16.mxu1 %vm2272_vm2, %v2268_v33  ;;  %s2948_s13 = sld [smem:[#allocation17_spill]]  ;;  %s2109_s28 = sshll.u32 %s2274_s3, 4  ;;  %s2110_s28 = int_to_ptr.vmem [resolvable:$false] %s2109_s28 }
  0x8d   : > { %v913_v41 = vrot.slane %v904_v32, %v2574_v5  ;;  %v920_v42 = vrot.slane %v906_v37, %v2574_v5  ;;  %v942_v45 = vrot.slane %v935_v43, %v2574_v5  ;;  %v949_v46 = vrot.slane %v933_v39, %v2574_v5  ;;  %1750 = vst.sshfl [vmem:[#allocation2] sm:$0xf pattern:$0x76325410] %v445_v27  ;;  %v467_v37 = vld [vmem:[%s2550_s20] sm:$0x3f] }
  0x8e   : > { %v1108_v36 = vrot.slane %v1101_v31, %v2574_v5  ;;  %v978_v40 = vrot.slane %v964_v38, %v2574_v5  ;;  %v985_v47 = vcombine.low %v983_v44, %v983_v44  ;;  %v999_v50 = vrot.slane %v983_v44, %v2574_v5  ;;  %v649_v31 = vld [vmem:[%s2550_s20] sm:$0x3f] }
  0x8f   : > { %1174 = vrot.lane.b32.xlu1 %v1166_v12, %s2263_s7  ;;  %1203 = vrot.lane.b32.xlu0 %v1195_v13, %s2265_s18  ;;  %v797_v53 = vrot.slane %v788_v48, %v2574_v5  ;;  %v804_v54 = vrot.slane %v790_v51, %v2574_v5  ;;  %v826_v57 = vrot.slane %v819_v55, %v2574_v5  ;;  %v759_v13 = vld [vmem:[%s2558_s10] sm:$0x3f]  ;;  %v2273_v51 = vmov 0   ;;  %s1814_s10 = smul.u32 24, %s2546_s12 }
  0x90   : > { %982 = vst.msk [vmem:[#allocation2 + $0x74] sm:$0x3] %vm465_vm0, %v978_v40  ;;  %v992_v49 = vrot.slane %v985_v47, %v2574_v5  ;;  %v833_v58 = vrot.slane %v817_v52, %v2574_v5  ;;  %v848_v59 = vcombine.high %v846_v56, %v846_v56  ;;  %v725_v62 = vrot.slane %v709_v61, %v2574_v5 }
  0x91   : > { %v855_v63 = vrot.slane %v846_v56, %v2574_v5  ;;  %v877_v1 = vcombine.low %v875_v60, %v875_v60  ;;  %v711_v4 = vcombine.low %v709_v61, %v709_v61  ;;  %v891_v7 = vrot.slane %v875_v60, %v2574_v5  ;;  %1398 = vmatprep.mubr.bf16.mxu0 %v2273_v51  ;;  %s2800_s4 = scalar_lea.vmem [#allocation9], %s1814_s10 }
  0x92   : > { %v862_v0 = vrot.slane %v848_v59, %v2574_v5  ;;  %729 = vst.msk [vmem:[#allocation2 + $0x38] sm:$0xc] %vm497_vm1, %v725_v62  ;;  %v681_v8 = vcombine.high %v679_v2, %v679_v2  ;;  %v688_v10 = vrot.slane %v679_v2, %v2574_v5  ;;  %v732_v12 = vcombine.high %v730_v9, %v730_v9 }
  0x93   : > { %1205 = vrot.lane.b32.xlu1 %v1202_v17, %s2265_s18  ;;  %1029 = vrot.lane.b32.xlu0 %v1021_v18, %s2266_s24  ;;  %v884_v6 = vrot.slane %v877_v1, %v2574_v5  ;;  %1751 = vst.sshfl [vmem:[#allocation2 + $0x30] sm:$0xf0 pattern:$0x76325410] %v711_v4  ;;  %v739_v14 = vrot.slane %v730_v9, %v2574_v5  ;;  %v559_v17 = vld [vmem:[%s2550_s20] sm:$0x3f] }
  0x94   : > { %v695_v11 = vrot.slane %v681_v8, %v2574_v5  ;;  %v746_v15 = vrot.slane %v732_v12, %v2574_v5  ;;  %v761_v16 = vcombine.low %v759_v13, %v759_v13  ;;  %v775_v19 = vrot.slane %v759_v13, %v2574_v5 }
  0x95   : > { %v561_v20 = vcombine.high %v559_v17, %v559_v17  ;;  %v665_v39 = vrot.slane %v649_v31, %v2574_v5  ;;  %v469_v40 = vcombine.low %v467_v37, %v467_v37  ;;  %vm490_vm3 = vcmask 1043456  }
  0x96   : > { %v768_v18 = vrot.slane %v761_v16, %v2574_v5  ;;  %vm673_vm4 = vcmask 744448   ;;  %vm703_vm5 = vcmask 736256   ;;  %vm643_vm6 = vcmask 752640  }
  0x97   : > { %1147 = vrot.lane.b32.xlu0 %v1144_v21, %s2264_s15  ;;  %1031 = vrot.lane.b32.xlu1 %v1028_v22, %s2266_s24  ;;  %v589_v21 = vld [vmem:[%s2550_s20] sm:$0x3f]  ;;  %v568_v22 = vrot.slane %v559_v17, %v2574_v5  ;;  %v575_v23 = vrot.slane %v561_v20, %v2574_v5  ;;  %v476_v43 = vrot.slane %v469_v40, %v2574_v5  ;;  %vm523_vm7 = vcmask 1031168  }
  0x98   : > { %v591_v24 = vcombine.low %v589_v21, %v589_v21  ;;  %vm553_vm8 = vcmask 900096   ;;  %vm1356_vm9 = vcmask 1045504   ;;  %vm583_vm10 = vcmask 891904  }
  0x99   : > { %vm613_vm11 = vcmask 883712   ;;  %vm492_vm12 = vcmask 1039360   ;;  %vm1469_vm13 = vcmask 261120  }
  0x9a   : > { %v598_v28 = vrot.slane %v591_v24, %v2574_v5 }
  0x9b   : > { %1058 = vrot.lane.b32.xlu0 %v1050_v25, %s2267_s21  ;;  %1060 = vrot.lane.b32.xlu1 %v1057_v26, %s2267_s21  ;;  %v619_v25 = vld [vmem:[%s2550_s20] sm:$0x3f]  ;;  %v605_v26 = vrot.slane %v589_v21, %v2574_v5 }
  0x9f   : > { %1087 = vrot.lane.b32.xlu0 %v1079_v29, %s2269_s1  ;;  %1089 = vrot.lane.b32.xlu1 %v1086_v30, %s2269_s1  ;;  %v621_v29 = vcombine.high %v619_v25, %v619_v25  ;;  %v447_v30 = vcombine.high %v445_v27, %v445_v27 }
  0xa1   : > { %v461_v32 = vrot.slane %v447_v30, %v2574_v5  ;;  %v635_v35 = vrot.slane %v621_v29, %v2574_v5 }
  0xa3   : > { %1116 = vrot.lane.b32.xlu0 %v1108_v36, %s2270_s6  ;;  %1118 = vrot.lane.b32.xlu1 %v1115_v34, %s2270_s6  ;;  %v628_v34 = vrot.slane %v619_v25, %v2574_v5  ;;  %v651_v36 = vcombine.low %v649_v31, %v649_v31  ;;  %466 = vst.msk [vmem:[#allocation2 + $0x8] sm:$0x3] %vm465_vm0, %v461_v32 }
  0xa5   : > { %v658_v38 = vrot.slane %v651_v36, %v2574_v5 }
  0xa7   : > { %921 = vrot.lane.b32.xlu0 %v913_v41, %s2263_s7  ;;  %923 = vrot.lane.b32.xlu1 %v920_v42, %s2263_s7  ;;  %v499_v41 = vld [vmem:[%s2550_s20] sm:$0x3f]  ;;  %v483_v42 = vrot.slane %v467_v37, %v2574_v5 }
  0xa8   : > { %v501_v44 = vcombine.high %v499_v41, %v499_v41  ;;  %v508_v47 = vrot.slane %v499_v41, %v2574_v5 }
  0xab   : > { %950 = vrot.lane.b32.xlu0 %v942_v45, %s2265_s18  ;;  %952 = vrot.lane.b32.xlu1 %v949_v46, %s2265_s18  ;;  %v529_v45 = vld [vmem:[%s2550_s20] sm:$0x3f]  ;;  %v515_v46 = vrot.slane %v501_v44, %v2574_v5 }
  0xac   : > { %v531_v48 = vcombine.low %v529_v45, %v529_v45 }
  0xaf   : > { %1000 = vrot.lane.b32.xlu0 %v992_v49, %s2271_s5  ;;  %1002 = vrot.lane.b32.xlu1 %v999_v50, %s2271_s5  ;;  %v545_v49 = vrot.slane %v529_v45, %v2574_v5  ;;  %v538_v50 = vrot.slane %v531_v48, %v2574_v5 }
  0xb3   : > { %805 = vrot.lane.b32.xlu0 %v797_v53, %s2267_s21  ;;  %807 = vrot.lane.b32.xlu1 %v804_v54, %s2267_s21 }
  0xb7   : > { %834 = vrot.lane.b32.xlu0 %v826_v57, %s2269_s1  ;;  %836 = vrot.lane.b32.xlu1 %v833_v58, %s2269_s1 }
  0xbb   : > { %863 = vrot.lane.b32.xlu0 %v855_v63, %s2270_s6  ;;  %865 = vrot.lane.b32.xlu1 %v862_v0, %s2270_s6 }
  0xbf   : > { %892 = vrot.lane.b32.xlu0 %v884_v6, %s2264_s15  ;;  %894 = vrot.lane.b32.xlu1 %v891_v7, %s2264_s15 }
  0xc3   : > { %696 = vrot.lane.b32.xlu0 %v688_v10, %s2265_s18  ;;  %698 = vrot.lane.b32.xlu1 %v695_v11, %s2265_s18 }
  0xc7   : > { %747 = vrot.lane.b32.xlu0 %v739_v14, %s2271_s5  ;;  %749 = vrot.lane.b32.xlu1 %v746_v15, %s2271_s5 }
  0xcb   : > { %776 = vrot.lane.b32.xlu0 %v768_v18, %s2266_s24  ;;  %778 = vrot.lane.b32.xlu1 %v775_v19, %s2266_s24 }
  0xcf   : > { %576 = vrot.lane.b32.xlu0 %v568_v22, %s2269_s1  ;;  %578 = vrot.lane.b32.xlu1 %v575_v23, %s2269_s1 }
  0xd3   : > { %606 = vrot.lane.b32.xlu0 %v598_v28, %s2270_s6  ;;  %608 = vrot.lane.b32.xlu1 %v605_v26, %s2270_s6 }
  0xd7   : > { %636 = vrot.lane.b32.xlu0 %v628_v34, %s2264_s15  ;;  %638 = vrot.lane.b32.xlu1 %v635_v35, %s2264_s15  ;;  %s1816_s15 = smul.u32 24, %s2948_s13 }
  0xdb   : > { %666 = vrot.lane.b32.xlu0 %v658_v38, %s2263_s7  ;;  %668 = vrot.lane.b32.xlu1 %v665_v39, %s2263_s7  ;;  %s1815_s7 = smul.u32 3, %s2947_s19 }
  0xdd   : > { %s1518_s18 = sadd.s32 %s1816_s15, %s1815_s7 }
  0xdf   : > { %486 = vrot.lane.b32.xlu1 %v483_v42, %s2271_s5  ;;  %484 = vrot.lane.b32.xlu0 %v476_v43, %s2271_s5  ;;  %s2949_s5 = sld [smem:[#allocation27_spill]] }
  0xe3   : > { %518 = vrot.lane.b32.xlu1 %v515_v46, %s2266_s24  ;;  %516 = vrot.lane.b32.xlu0 %v508_v47, %s2266_s24  ;;  %s1522_s24 = sshll.u32 %s2800_s4, 4  ;;  %s1523_s24 = int_to_ptr.vmem [resolvable:$true] %s1522_s24 }
  0xe4   : > { %p2112_p13 = scmp.lt.s32.totalorder %s1523_s24, %s2110_s28 }
  0xe7   : > { %548 = vrot.lane.b32.xlu1 %v545_v49, %s2267_s21  ;;  %546 = vrot.lane.b32.xlu0 %v538_v50, %s2267_s21  ;;  %s1777_s21 = sshll.u32 %s1518_s18, 7 }
  0xe8   : > { %s1520_s20 = scalar_lea.hbm %s2949_s5, %s1777_s21 }
  0xfd   : > { %v1177_v52 = vpop.permute.xlu1 %1176  ;;  %v1146_v53 = vpop.permute.xlu0 %1145 }
  0xfe   : > { %1185 = vst.msk [vmem:[#allocation2 + $0x98] sm:$0xc] %vm497_vm1, %v1177_v52  ;;  %v1179_v56 = vrot.slane %v1177_v52, 4  ;;  %v1149_v4 = vrot.slane %v1146_v53, 4 }
 0x101   : > { %v1175_v54 = vpop.permute.xlu1 %1174  ;;  %v1204_v55 = vpop.permute.xlu0 %1203 }
 0x102   : > { %v1178_v57 = vrot.slane %v1175_v54, 4  ;;  %v1207_v61 = vrot.slane %v1204_v55, 4 }
 0x104   : > { %v1180_v5 = vsel %vm490_vm3, %v1178_v57, %v1179_v56 }
 0x105   : > { %v1181_v58 = vsel %vm673_vm4, %v1175_v54, %v1180_v5  ;;  %v1206_v59 = vpop.permute.xlu1 %1205  ;;  %v1030_v60 = vpop.permute.xlu0 %1029 }
 0x106   : > { %1184 = vst [vmem:[#allocation2 + $0x90] sm:$0xcc] %v1181_v58  ;;  %v1208_v62 = vrot.slane %v1206_v59, 4  ;;  %1214 = vst.msk [vmem:[#allocation2 + $0xa4] sm:$0x3] %vm465_vm0, %v1206_v59  ;;  %v1033_v6 = vrot.slane %v1030_v60, 4 }
 0x108   : > { %v1209_v63 = vsel %vm490_vm3, %v1207_v61, %v1208_v62 }
 0x109   : > { %v1210_v0 = vsel %vm703_vm5, %v1204_v55, %v1209_v63  ;;  %v1148_v1 = vpop.permute.xlu0 %1147  ;;  %v1032_v2 = vpop.permute.xlu1 %1031 }
 0x10a   : > { %1213 = vst [vmem:[#allocation2 + $0x9c] sm:$0x33] %v1210_v0  ;;  %v1150_v7 = vrot.slane %v1148_v1, 4  ;;  %1156 = vst.msk [vmem:[#allocation2 + $0x98] sm:$0x3] %vm465_vm0, %v1148_v1  ;;  %v1034_v8 = vrot.slane %v1032_v2, 4 }
 0x10b   : > { %1040 = vst.msk [vmem:[#allocation2 + $0x80] sm:$0x3] %vm465_vm0, %v1032_v2 }
 0x10c   : > { %v1151_v9 = vsel %vm490_vm3, %v1149_v4, %v1150_v7  ;;  %v1035_v10 = vsel %vm490_vm3, %v1033_v6, %v1034_v8 }
 0x10d   : > { %v1152_v11 = vsel %vm643_vm6, %v1146_v53, %v1151_v9  ;;  %v1036_v12 = vsel %vm523_vm7, %v1030_v60, %v1035_v10  ;;  %v1059_v13 = vpop.permute.xlu0 %1058  ;;  %v1061_v14 = vpop.permute.xlu1 %1060 }
 0x10e   : > { %1155 = vst [vmem:[#allocation2 + $0x90] sm:$0x33] %v1152_v11  ;;  %1039 = vst [vmem:[#allocation2 + $0x78] sm:$0x33] %v1036_v12  ;;  %v1062_v15 = vrot.slane %v1059_v13, 4  ;;  %v1063_v16 = vrot.slane %v1061_v14, 4 }
 0x10f   : > { %1069 = vst.msk [vmem:[#allocation2 + $0x80] sm:$0xc] %vm497_vm1, %v1061_v14 }
 0x110   : > { %v1064_v17 = vsel %vm490_vm3, %v1062_v15, %v1063_v16 }
 0x111   : > { %v1065_v18 = vsel %vm553_vm8, %v1059_v13, %v1064_v17  ;;  %v1088_v19 = vpop.permute.xlu0 %1087  ;;  %v1090_v20 = vpop.permute.xlu1 %1089  ;;  %v1989_v21 = vld [vmem:[#allocation2 + $0x98] ss:$12 sps:$4 sm:$0x3f]  }
 0x112   : > { %1068 = vst [vmem:[#allocation2 + $0x78] sm:$0xcc] %v1065_v18  ;;  %v1091_v22 = vrot.slane %v1088_v19, 4  ;;  %v1092_v23 = vrot.slane %v1090_v20, 4  ;;  %1098 = vst.msk [vmem:[#allocation2 + $0x8c] sm:$0x3] %vm465_vm0, %v1090_v20 }
 0x113   : > { %v1364_v24 = vsel %vm1356_vm9, %v1989_v21, 0 }
 0x114   : > { %v1093_v25 = vsel %vm490_vm3, %v1091_v22, %v1092_v23  ;;  %1789 = vmatpush3.bf16.msra.mxu1 %v1364_v24 }
 0x115   : > { %v1094_v26 = vsel %vm583_vm10, %v1088_v19, %v1093_v25  ;;  %v1117_v27 = vpop.permute.xlu0 %1116  ;;  %v1119_v28 = vpop.permute.xlu1 %1118  ;;  %v1990_v29 = vld [vmem:[#allocation2 + $0x94] ss:$12 sps:$4 sm:$0x3f]   ;;  %1790 = vmatprep.subr.bf16.mxu1 %v2268_v33  ;;  %v1992_v32 = vld [vmem:[#allocation2 + $0x90] ss:$12 sps:$4 sm:$0x3f]  }
 0x116   : > { %1097 = vst [vmem:[#allocation2 + $0x84] sm:$0x33] %v1094_v26  ;;  %v1120_v30 = vrot.slane %v1117_v27, 4  ;;  %v1121_v31 = vrot.slane %v1119_v28, 4  ;;  %1127 = vst.msk [vmem:[#allocation2 + $0x8c] sm:$0xc] %vm497_vm1, %v1119_v28  ;;  %1774 = vmatprep.subr.msk.bf16.mxu0 %vm1356_vm9, %v1990_v29 }
 0x117   : > { %v1358_v35 = vsel %vm1356_vm9, %v1992_v32, 0 }
 0x118   : > { %v1122_v34 = vsel %vm490_vm3, %v1120_v30, %v1121_v31  ;;  %1369 = vmatpush1.bf16.msra.mxu0 %v1358_v35 }
 0x119   : > { %v1123_v36 = vsel %vm613_vm11, %v1117_v27, %v1122_v34  ;;  %v922_v37 = vpop.permute.xlu0 %921  ;;  %v924_v38 = vpop.permute.xlu1 %923 }
 0x11a   : > { %1126 = vst [vmem:[#allocation2 + $0x84] sm:$0xcc] %v1123_v36  ;;  %v925_v39 = vrot.slane %v922_v37, 4  ;;  %v926_v40 = vrot.slane %v924_v38, 4  ;;  %932 = vst.msk [vmem:[#allocation2 + $0x68] sm:$0x3] %vm465_vm0, %v924_v38 }
 0x11c   : > { %v927_v41 = vsel %vm490_vm3, %v925_v39, %v926_v40 }
 0x11d   : > { %v928_v42 = vsel %vm673_vm4, %v922_v37, %v927_v41  ;;  %v951_v43 = vpop.permute.xlu0 %950  ;;  %v953_v44 = vpop.permute.xlu1 %952  ;;  %v1993_v45 = vld [vmem:[#allocation2 + $0x80] ss:$12 sps:$4 sm:$0xff]  }
 0x11e   : > { %931 = vst [vmem:[#allocation2 + $0x60] sm:$0x33] %v928_v42  ;;  %v954_v46 = vrot.slane %v951_v43, 4  ;;  %v955_v47 = vrot.slane %v953_v44, 4  ;;  %961 = vst.msk [vmem:[#allocation2 + $0x68] sm:$0xc] %vm497_vm1, %v953_v44  ;;  %1791 = vmatpush3.bf16.msra.mxu1 %v1993_v45 }
 0x11f   : > { %1792 = vmatprep.subr.bf16.mxu1 %v2268_v33 }
 0x120   : > { %v956_v48 = vsel %vm490_vm3, %v954_v46, %v955_v47 }
 0x121   : > { %v957_v49 = vsel %vm703_vm5, %v951_v43, %v956_v48  ;;  %v1001_v50 = vpop.permute.xlu0 %1000  ;;  %v1003_v51 = vpop.permute.xlu1 %1002  ;;  %v1994_v52 = vld [vmem:[#allocation2 + $0x7c] ss:$12 sps:$4 sm:$0xff]   ;;  %v1996_v53 = vld [vmem:[#allocation2 + $0x78] ss:$12 sps:$4 sm:$0xff]  }
 0x122   : > { %960 = vst [vmem:[#allocation2 + $0x60] sm:$0xcc] %v957_v49  ;;  %v1004_v54 = vrot.slane %v1001_v50, 4  ;;  %v1005_v55 = vrot.slane %v1003_v51, 4  ;;  %1011 = vst.msk [vmem:[#allocation2 + $0x74] sm:$0xc] %vm497_vm1, %v1003_v51  ;;  %1370 = vmatprep.subr.bf16.mxu0 %v1994_v52 }
 0x123   : > { %1371 = vmatpush1.bf16.msra.mxu0 %v1996_v53 }
 0x124   : > { %v1006_v56 = vsel %vm490_vm3, %v1004_v54, %v1005_v55 }
 0x125   : > { %v1007_v57 = vsel %vm492_vm12, %v1001_v50, %v1006_v56  ;;  %v806_v5 = vpop.permute.xlu0 %805  ;;  %v808_v58 = vpop.permute.xlu1 %807 }
 0x126   : > { %1010 = vst [vmem:[#allocation2 + $0x6c] sm:$0xcc] %v1007_v57  ;;  %v809_v59 = vrot.slane %v806_v5, 4  ;;  %v810_v60 = vrot.slane %v808_v58, 4  ;;  %816 = vst.msk [vmem:[#allocation2 + $0x50] sm:$0x3] %vm465_vm0, %v808_v58 }
 0x128   : > { %v811_v61 = vsel %vm490_vm3, %v809_v59, %v810_v60 }
 0x129   : > { %v812_v62 = vsel %vm553_vm8, %v806_v5, %v811_v61  ;;  %v835_v63 = vpop.permute.xlu0 %834  ;;  %v837_v0 = vpop.permute.xlu1 %836  ;;  %v1998_v1 = vld [vmem:[#allocation2 + $0x68] ss:$12 sps:$4 sm:$0xff]  }
 0x12a   : > { %815 = vst [vmem:[#allocation2 + $0x48] sm:$0x33] %v812_v62  ;;  %v838_v2 = vrot.slane %v835_v63, 4  ;;  %v839_v4 = vrot.slane %v837_v0, 4  ;;  %845 = vst.msk [vmem:[#allocation2 + $0x50] sm:$0xc] %vm497_vm1, %v837_v0  ;;  %1793 = vmatpush3.bf16.msra.mxu1 %v1998_v1 }
 0x12b   : > { %1794 = vmatprep.subr.bf16.mxu1 %v2268_v33 }
 0x12c   : > { %v840_v6 = vsel %vm490_vm3, %v838_v2, %v839_v4 }
 0x12d   : > { %v841_v7 = vsel %vm583_vm10, %v835_v63, %v840_v6  ;;  %v864_v8 = vpop.permute.xlu0 %863  ;;  %v866_v9 = vpop.permute.xlu1 %865  ;;  %v1999_v10 = vld [vmem:[#allocation2 + $0x64] ss:$12 sps:$4 sm:$0xff]   ;;  %v2001_v11 = vld [vmem:[#allocation2 + $0x60] ss:$12 sps:$4 sm:$0xff]  }
 0x12e   : > { %844 = vst [vmem:[#allocation2 + $0x48] sm:$0xcc] %v841_v7  ;;  %v867_v12 = vrot.slane %v864_v8, 4  ;;  %v868_v13 = vrot.slane %v866_v9, 4  ;;  %874 = vst.msk [vmem:[#allocation2 + $0x5c] sm:$0x3] %vm465_vm0, %v866_v9  ;;  %1372 = vmatprep.subr.bf16.mxu0 %v1999_v10 }
 0x12f   : > { %1373 = vmatpush1.bf16.msra.mxu0 %v2001_v11 }
 0x130   : > { %v869_v14 = vsel %vm490_vm3, %v867_v12, %v868_v13 }
 0x131   : > { %v870_v15 = vsel %vm613_vm11, %v864_v8, %v869_v14  ;;  %v893_v16 = vpop.permute.xlu0 %892  ;;  %v895_v17 = vpop.permute.xlu1 %894 }
 0x132   : > { %873 = vst [vmem:[#allocation2 + $0x54] sm:$0x33] %v870_v15  ;;  %v896_v18 = vrot.slane %v893_v16, 4  ;;  %v897_v19 = vrot.slane %v895_v17, 4  ;;  %903 = vst.msk [vmem:[#allocation2 + $0x5c] sm:$0xc] %vm497_vm1, %v895_v17 }
 0x134   : > { %v898_v20 = vsel %vm490_vm3, %v896_v18, %v897_v19 }
 0x135   : > { %v899_v21 = vsel %vm643_vm6, %v893_v16, %v898_v20  ;;  %v697_v22 = vpop.permute.xlu0 %696  ;;  %v699_v23 = vpop.permute.xlu1 %698 }
 0x136   : > { %902 = vst [vmem:[#allocation2 + $0x54] sm:$0xcc] %v899_v21  ;;  %v700_v24 = vrot.slane %v697_v22, 4  ;;  %v701_v25 = vrot.slane %v699_v23, 4  ;;  %708 = vst.msk [vmem:[#allocation2 + $0x38] sm:$0x3] %vm465_vm0, %v699_v23 }
 0x138   : > { %v702_v26 = vsel %vm490_vm3, %v700_v24, %v701_v25 }
 0x139   : > { %v704_v27 = vsel %vm703_vm5, %v697_v22, %v702_v26  ;;  %v748_v28 = vpop.permute.xlu0 %747  ;;  %v750_v29 = vpop.permute.xlu1 %749  ;;  %v2002_v30 = vld [vmem:[#allocation2 + $0x50] ss:$12 sps:$4 sm:$0xff]  }
 0x13a   : > { %707 = vst [vmem:[#allocation2 + $0x30] sm:$0x33] %v704_v27  ;;  %v751_v31 = vrot.slane %v748_v28, 4  ;;  %v752_v32 = vrot.slane %v750_v29, 4  ;;  %758 = vst.msk [vmem:[#allocation2 + $0x44] sm:$0x3] %vm465_vm0, %v750_v29  ;;  %1795 = vmatpush3.bf16.msra.mxu1 %v2002_v30 }
 0x13b   : > { %1796 = vmatprep.subr.bf16.mxu1 %v2268_v33  ;;  %v444_v29 = vld [vmem:[%s2945_s2] sm:$0xf]  ;;  %s2105_s2 = scalar_lea.vmem %s1523_s24, 384 }
 0x13c   : > { %v753_v34 = vsel %vm490_vm3, %v751_v31, %v752_v32  ;;  %v1459_v32 = vsub.s32 2, %v2571_v3  ;;  %p2106_p7 = scmp.ne.s32.totalorder %s1523_s24, %s2105_s2 }
 0x13d   : > { %v754_v35 = vsel %vm492_vm12, %v748_v28, %v753_v34  ;;  %v777_v36 = vpop.permute.xlu0 %776  ;;  %v779_v37 = vpop.permute.xlu1 %778  ;;  %v2003_v38 = vld [vmem:[#allocation2 + $0x4c] ss:$12 sps:$4 sm:$0xff]   ;;  %v2005_v39 = vld [vmem:[#allocation2 + $0x48] ss:$12 sps:$4 sm:$0xff]   ;;  %v1447_v34 = vld [vmem:[%s2946_s27] sm:$0x7] }
 0x13e   : > { %757 = vst [vmem:[#allocation2 + $0x3c] sm:$0x33] %v754_v35  ;;  %v780_v40 = vrot.slane %v777_v36, 4  ;;  %v781_v41 = vrot.slane %v779_v37, 4  ;;  %787 = vst.msk [vmem:[#allocation2 + $0x44] sm:$0xc] %vm497_vm1, %v779_v37  ;;  %1374 = vmatprep.subr.bf16.mxu0 %v2003_v38  ;;  %v1460_v35 = vrot.slane %v1447_v34, %v1459_v32  ;;  %p2107_p0 = pnand %p2106_p7, %p2486_p12 }
 0x13f   : > { %1375 = vmatpush1.bf16.msra.mxu0 %v2005_v39  ;;  %v1455_v38 = vsub.s32 1, %v2571_v3  ;;  %s2111_s27 = scalar_lea.vmem %s2110_s28, 768 }
 0x140   : > { %v782_v42 = vsel %vm490_vm3, %v780_v40, %v781_v41  ;;  %p2108_p8 = pneg %p2107_p0  ;;  %p2113_p11 = scmp.lt.s32.totalorder %s2111_s27, %s2105_s2 }
 0x141   : > { %v783_v43 = vsel %vm523_vm7, %v777_v36, %v782_v42  ;;  %v577_v44 = vpop.permute.xlu0 %576  ;;  %v579_v45 = vpop.permute.xlu1 %578  ;;  %v1451_v36 = vsub.s32 0, %v2571_v3 }
 0x142   : > { %786 = vst [vmem:[#allocation2 + $0x3c] sm:$0xcc] %v783_v43  ;;  %v580_v46 = vrot.slane %v577_v44, 4  ;;  %v581_v47 = vrot.slane %v579_v45, 4  ;;  %588 = vst.msk [vmem:[#allocation2 + $0x20] sm:$0x3] %vm465_vm0, %v579_v45  ;;  %v1456_v43 = vrot.slane %v1447_v34, %v1455_v38  ;;  %p2114_p10 = por %p2113_p11, %p2112_p13 }
 0x143   : > { %v1452_v41 = vrot.slane %v1447_v34, %v1451_v36 }
 0x144   : > { %v582_v48 = vsel %vm490_vm3, %v580_v46, %v581_v47  ;;  %p2115_p3 = pnand %p2114_p10, %p2108_p8 }
 0x145   : > { %v584_v49 = vsel %vm583_vm10, %v577_v44, %v582_v48  ;;  %v607_v50 = vpop.permute.xlu0 %606  ;;  %v609_v51 = vpop.permute.xlu1 %608  ;;  %v2006_v52 = vld [vmem:[#allocation2 + $0x38] ss:$12 sps:$4 sm:$0xff]  }
 0x146   : > { %587 = vst [vmem:[#allocation2 + $0x18] sm:$0x33] %v584_v49  ;;  %v610_v53 = vrot.slane %v607_v50, 4  ;;  %v611_v54 = vrot.slane %v609_v51, 4  ;;  %618 = vst.msk [vmem:[#allocation2 + $0x20] sm:$0xc] %vm497_vm1, %v609_v51  ;;  %1797 = vmatpush3.bf16.msra.mxu1 %v2006_v52 }
 0x147   : > { %1798 = vmatprep.subr.bf16.mxu1 %v2268_v33 }
 0x148   : > { %v612_v55 = vsel %vm490_vm3, %v610_v53, %v611_v54 }
 0x149   : > { %v614_v56 = vsel %vm613_vm11, %v607_v50, %v612_v55  ;;  %v637_v57 = vpop.permute.xlu0 %636  ;;  %v639_v5 = vpop.permute.xlu1 %638  ;;  %v2007_v58 = vld [vmem:[#allocation2 + $0x34] ss:$12 sps:$4 sm:$0xff]   ;;  %v2009_v59 = vld [vmem:[#allocation2 + $0x30] ss:$12 sps:$4 sm:$0xff]  }
 0x14a   : > { %617 = vst [vmem:[#allocation2 + $0x18] sm:$0xcc] %v614_v56  ;;  %v640_v60 = vrot.slane %v637_v57, 4  ;;  %v641_v61 = vrot.slane %v639_v5, 4  ;;  %648 = vst.msk [vmem:[#allocation2 + $0x2c] sm:$0x3] %vm465_vm0, %v639_v5  ;;  %1376 = vmatprep.subr.bf16.mxu0 %v2007_v58 }
 0x14b   : > { %1377 = vmatpush1.bf16.msra.mxu0 %v2009_v59 }
 0x14c   : > { %v642_v62 = vsel %vm490_vm3, %v640_v60, %v641_v61 }
 0x14d   : > { %v644_v63 = vsel %vm643_vm6, %v637_v57, %v642_v62  ;;  %v667_v0 = vpop.permute.xlu0 %666  ;;  %v669_v1 = vpop.permute.xlu1 %668 }
 0x14e   : > { %647 = vst [vmem:[#allocation2 + $0x24] sm:$0x33] %v644_v63  ;;  %v670_v2 = vrot.slane %v667_v0, 4  ;;  %v671_v4 = vrot.slane %v669_v1, 4  ;;  %678 = vst.msk [vmem:[#allocation2 + $0x2c] sm:$0xc] %vm497_vm1, %v669_v1 }
 0x150   : > { %v672_v6 = vsel %vm490_vm3, %v670_v2, %v671_v4 }
 0x151   : > { %v674_v7 = vsel %vm673_vm4, %v667_v0, %v672_v6  ;;  %v487_v8 = vpop.permute.xlu1 %486  ;;  %v485_v9 = vpop.permute.xlu0 %484 }
 0x152   : > { %677 = vst [vmem:[#allocation2 + $0x24] sm:$0xcc] %v674_v7  ;;  %v489_v10 = vrot.slane %v487_v8, 4  ;;  %498 = vst.msk [vmem:[#allocation2 + $0x8] sm:$0xc] %vm497_vm1, %v487_v8  ;;  %v488_v11 = vrot.slane %v485_v9, 4 }
 0x154   : > { %v491_v12 = vsel %vm490_vm3, %v488_v11, %v489_v10 }
 0x155   : > { %v493_v13 = vsel %vm492_vm12, %v485_v9, %v491_v12  ;;  %v519_v14 = vpop.permute.xlu1 %518  ;;  %v517_v15 = vpop.permute.xlu0 %516  ;;  %v2010_v16 = vld [vmem:[#allocation2 + $0x20] ss:$12 sps:$4 sm:$0xff]  }
 0x156   : > { %496 = vst [vmem:[#allocation2] sm:$0xcc] %v493_v13  ;;  %v521_v17 = vrot.slane %v519_v14, 4  ;;  %528 = vst.msk [vmem:[#allocation2 + $0x14] sm:$0x3] %vm465_vm0, %v519_v14  ;;  %v520_v18 = vrot.slane %v517_v15, 4  ;;  %1799 = vmatpush3.bf16.msra.mxu1 %v2010_v16 }
 0x157   : > { %1800 = vmatprep.subr.bf16.mxu1 %v2268_v33 }
 0x158   : > { %v522_v19 = vsel %vm490_vm3, %v520_v18, %v521_v17 }
 0x159   : > { %v524_v20 = vsel %vm523_vm7, %v517_v15, %v522_v19  ;;  %v549_v21 = vpop.permute.xlu1 %548  ;;  %v547_v22 = vpop.permute.xlu0 %546  ;;  %v2011_v23 = vld [vmem:[#allocation2 + $0x1c] ss:$12 sps:$4 sm:$0xff]   ;;  %v2013_v24 = vld [vmem:[#allocation2 + $0x18] ss:$12 sps:$4 sm:$0xff]  }
 0x15a   : > { %527 = vst [vmem:[#allocation2 + $0xc] sm:$0x33] %v524_v20  ;;  %v551_v25 = vrot.slane %v549_v21, 4  ;;  %558 = vst.msk [vmem:[#allocation2 + $0x14] sm:$0xc] %vm497_vm1, %v549_v21  ;;  %v550_v26 = vrot.slane %v547_v22, 4  ;;  %1378 = vmatprep.subr.bf16.mxu0 %v2011_v23 }
 0x15b   : > { %1379 = vmatpush1.bf16.msra.mxu0 %v2013_v24 }
 0x15c   : > { %v552_v27 = vsel %vm490_vm3, %v550_v26, %v551_v25 }
 0x15d   : > { %v554_v28 = vsel %vm553_vm8, %v547_v22, %v552_v27 }
 0x15e   : > { %557 = vst [vmem:[#allocation2 + $0xc] sm:$0xcc] %v554_v28 }
 0x161   : > { %v2015_v33 = vld [vmem:[#allocation2 + $0x8] ss:$12 sps:$4 sm:$0xff]  }
 0x162   : > { %1801 = vmatpush3.bf16.msra.mxu1 %v2015_v33 }
 0x165   : > { %v2016_v30 = vld [vmem:[#allocation2 + $0x4] ss:$12 sps:$4 sm:$0xff]   ;;  %v2018_v31 = vld [vmem:[#allocation2] ss:$12 sps:$4 sm:$0xff]   ;;  %1803 = vmatmul.mubr.msk.bf16.vlgmr.msra.gmra.mxu1 %vm613_vm11, %v444_v29 }
 0x166   : > { %1380 = vmatprep.subr.bf16.mxu0 %v2016_v30 }
 0x167   : > { %1381 = vmatpush1.bf16.msra.mxu0 %v2018_v31 }
 0x16a   : > { %1775 = vmatmul.mubr.msk.bf16.vlgmr.msra.gmra.mxu0 %vm613_vm11, %v444_v29 }
 0x225   : > { %v1441_v37 = vpop.f32.mrf.mxu1 }
 0x226   : > { %v1466_v39 = vmul.f32 %v1460_v35, %v1441_v37 }
 0x227   : > { %v1804_v40 = vpop.f32.mrf.mxu1 }
 0x228   : > { %1470 = vst.msk [vmem:[%s2800_s4 + $0x10] sm:$0xff] %vm1469_vm13, %v1466_v39  ;;  %v1479_v48 = vmul.f32 %v1466_v39, %v1466_v39  ;;  %v1472_v50 = vsel %vm1469_vm13, %v1466_v39, 0.0 }
 0x229   : > { %v1444_v42 = vpop.f32.mrf.mxu1 }
 0x22a   : > { %v1400_v44 = vpop.f32.mrf.mxu0  ;;  %v1481_v55 = vsel %vm1469_vm13, %v1479_v48, 0.0 }
 0x22b   : > { %v1464_v45 = vmul.f32 %v1452_v41, %v1400_v44  ;;  %v1805_v46 = vpop.f32.mrf.mxu1 }
 0x22c   : > { %v1402_v47 = vpop.f32.mrf.mxu0 }
 0x22d   : > { %1467 = vst [vmem:[%s2800_s4] sm:$0xff] %v1464_v45  ;;  %v1465_v3 = vmul.f32 %v1456_v43, %v1402_v47  ;;  %v1477_v51 = vmul.f32 %v1464_v45, %v1464_v45 }
 0x22e   : > { %v1404_v49 = vpop.f32.mrf.mxu0 }
 0x22f   : > { %1468 = vst [vmem:[%s2800_s4 + $0x8] sm:$0xff] %v1465_v3  ;;  %v1478_v52 = vmul.f32 %v1465_v3, %v1465_v3  ;;  %v1471_v53 = vadd.f32 %v1465_v3, %v1464_v45 }
 0x230   : > { %v1405_v54 = vpop.f32.mrf.mxu0 }
 0x231   : > { %v1473_v56 = vadd.f32 %v1472_v50, %v1471_v53  ;;  %v1480_v57 = vadd.f32 %v1478_v52, %v1477_v51 }
 0x233   : > { %1474 = vadd.xlane.f32.xlu0 %v1473_v56  ;;  %v1482_v5 = vadd.f32 %v1481_v55, %v1480_v57 }
 0x235   : > { %1483 = vadd.xlane.f32.xlu1 %v1482_v5 }
 0x236   : > { %2118 = shalt.err (!%p2115_p3)
}
 0x237   : > { %s2119_s10 = scalar_lea.hbm %s1520_s20, 384  ;;  %s2123_s7 = scalar_lea.hbm %s2949_s5, 6144 }
 0x238   : > { %p2120_p1 = scmp.ne.s32.totalorder %s1520_s20, %s2119_s10  ;;  %p2124_p4 = scmp.lt.s32.totalorder %s1520_s20, %s2949_s5 }
 0x239   : > { %p2125_p5 = scmp.lt.s32.totalorder %s2123_s7, %s2119_s10 }
 0x23a   : > { %p2121_p9 = pnand %p2120_p1, %p2486_p12 }
 0x23b   : > { %p2126_p2 = por %p2125_p5, %p2124_p4 }
 0x23c   : > { %p2122_p6 = pneg %p2121_p9 }
 0x23e   : > { %p2127_p7 = pnand %p2126_p2, %p2122_p6 }
 0x240   : > { %2130 = shalt.err (!%p2127_p7)
}
 0x241   : > { %1823 = dma.vmem_to_hbm [thread:$0]  (%p2486_p12), %s1523_s24, 384, %s1520_s20, %s1490_s17   ;;  %vm1486_vm14 = vcmask 7168  }
 0x242   : > { %p427_p0 = scmp.lt.s32.totalorder %s2948_s13, 1  ;;  %p429_p8 = scmp.lt.s32.totalorder %s2947_s19, 7 }
 0x243   : > { %s2950_s28 = sld [smem:[#allocation28_spill]] }
 0x244   : > { %s2974_s13 = smov (!%p427_p0, %s2948_s13), 1  ;;  %s2976_s19 = smov (!%p429_p8, %s2947_s19), 7 }
 0x245   : > { %s1746_s21 = sshll.u32 %s2974_s13, 3  ;;  %s2951_s12 = sld [smem:[#allocation29_spill]] }
 0x246   : > { %s432_s1 = sadd.s32 %s1746_s21, %s2976_s19 }
 0x247   : > { %s1747_s6 = sshll.u32 %s432_s1, 3 }
 0x249   : > { %s434_s27 = scalar_lea.vmem %s2950_s28, %s1747_s6 }
 0x24b   : > { %s442_s4 = scalar_lea.vmem %s2951_s12, %s1747_s6 }
 0x2bc   : > { %v1475_v58 = vpop.xlane.xlu0 %1474 }
 0x2bd   : > { %1487 = vst.msk [vmem:[%s434_s27] sm:$0xff] %vm1486_vm14, %v1475_v58 }
 0x2be   : > { %v1484_v59 = vpop.xlane.xlu1 %1483 }
 0x2bf   : > { %1488 = vst.msk [vmem:[%s442_s4] sm:$0xff] %vm1486_vm14, %v1484_v59 }
 0x2c0 PF: > { %p1840_p12 = scmp.ge.s32.totalorder %s2257_s14, 2  ;;  %s1540_s19 = sand.u32 1, %s2229_s30  }
 0x2c1   : > { %p2952_p13 = scmp.ne.s32.totalorder %s2934_s23, 0  ;;  %s1541_s13 = scalar_lea.sflag [#allocation5], %s1540_s19 }
 0x2c3   : > { %p1836_p11 = pnand %p1840_p12, %p2952_p13 }
 0x2c5   : > { %p1837_p10 = pneg %p1836_p11 }
 0x2c7   : > { %2200 = dma.done.wait (%p1837_p10), %s1541_s13, 384  }
 0x2c8   : > { %2202 = vsyncadd (%p1837_p10), %s1541_s13, 4294966912  ;;  %s27_s14 = sadd.s32 1, %s2257_s14   ;;  %s2954_s27 = sld [smem:[#allocation15_spill]] }
 0x2c9   : > { %p2842_p3 = scmp.ge.s32.totalorder %s27_s14, 18   ;;  %s2955_s10 = sld [smem:[#allocation18_spill]] }
 0x2ca   : > { %s2956_s23 = sld [smem:[#allocation19_spill]]  ;;  %s2960_s24 = smov %s2209_s25 }
 0x2cb   : > { %s2957_s12 = sld [smem:[#allocation20_spill]]  ;;  %s2961_s25 = smov %s2213_s26 }
 0x2cc   : > { %s2958_s13 = sld [smem:[#allocation21_spill]]  ;;  %s2962_s26 = smov %s2515_s0 }
 0x2cd   : > { %s2963_s28 = smov %s2225_s29  ;;  %s2964_s29 = smov %s2425_s11 }
 0x2ce   : > { %s2965_s30 = smov %s2233_s8  ;;  %s2966_s8 = smov %s2237_s9 }
 0x2cf   : > { %s2967_s9 = smov %s2476_s22  ;;  %26 = sbr.rel (!%p2842_p3) target bundleno = 21 (0x15), region = 133 }
 0x2d0   : > { %s2968_s11 = smov %s2956_s23 }
 0x2d4   :  { %1568 = vsyncpa [#allocation4], 1 }
 0x2d5   :  { %1570 = vsyncpa [#allocation4 + $0x1], 1 }
 0x2d6   :  { %1571 = vsyncpa [#allocation7], 1 }
 0x2d7   :  { %1573 = vsyncpa [#allocation7 + $0x1], 1 }
 0x2d8   :  { %1574 = vsyncpa [#allocation5], 1 }
 0x2d9   :  { %1576 = vsyncpa [#allocation5 + $0x1], 1 }

</bundles_post_ra>
